<compile_context>
chip_gen: v5e
topology: v5e:2x2
jax: 0.10.0
libtpu: 0.0.40
codegen_flags: <defaults>
</compile_context>

<pallas_src>
import functools

import jax
import jax.numpy as jnp
from jax.experimental import pallas as pl
from jax.experimental.pallas import tpu as pltpu


# ------------------------------ Pallas kernel ------------------------------ #

def _resblock_kernel(x_ref, w1_ref, b1_ref, g1_ref, be1_ref,
                     w2_ref, b2_ref, g2_ref, be2_ref,
                     w3_ref, b3_ref, gmat_ref, wmask_ref,
                     o_ref, pad_ref, *, width, pad_off, slope, eps):
    midc = w1_ref.shape[0]
    hw = x_ref.shape[2]

    xs = x_ref[0]                                        # (inc, HW) float32

    def lrelu(v):
        return jnp.where(v >= 0, v, slope * v)

    gmat = gmat_ref[...]                                 # (midc, midc) group-avg matrix

    def group_norm(h, scale_ref, bias_ref):
        # gmat already carries the 1/(channels_per_group * HW) factor, so a row
        # of (gmat @ X) summed over lanes is that channel's group mean of X.
        mean = jnp.sum(jnp.dot(gmat, h, preferred_element_type=jnp.float32),
                       axis=1, keepdims=True)            # (midc, 1)
        centered = h - mean
        var = jnp.sum(jnp.dot(gmat, centered * centered,
                              preferred_element_type=jnp.float32),
                      axis=1, keepdims=True)             # (midc, 1)
        inv = jax.lax.rsqrt(var + eps)
        return centered * inv * scale_ref[...] + bias_ref[...]

    # ---- conv1 (1x1) + GN1 + LeakyReLU ------------------------------------
    h1 = jnp.dot(w1_ref[...], xs, preferred_element_type=jnp.float32) + b1_ref[...]
    a1 = lrelu(group_norm(h1, g1_ref, be1_ref))          # (midc, HW)

    # ---- conv2 (3x3, pad=1) as 9 shifted matmuls ---------------------------
    # Zero-padded scratch handles h (row) boundaries; per-lane masks handle
    # w (column) boundaries of the flattened H*W axis.
    pad_ref[...] = jnp.zeros(pad_ref.shape, pad_ref.dtype)
    pad_ref[:, pad_off:pad_off + hw] = a1
    padv = pad_ref[...]                                  # (midc, HW + 2*pad_off)

    mask_l = wmask_ref[0:1, :]                           # (1, HW): w-1 is valid
    mask_r = wmask_ref[1:2, :]                           # (1, HW): w+1 is valid

    acc = jnp.zeros((midc, hw), jnp.float32)
    for t in range(9):
        dy, dx = t // 3 - 1, t % 3 - 1
        start = pad_off + dy * width + dx                # static offset
        shifted = padv[:, start:start + hw]              # (midc, HW)
        if dx == -1:
            shifted = shifted * mask_l
        elif dx == 1:
            shifted = shifted * mask_r
        acc = acc + jnp.dot(w2_ref[t], shifted,
                            preferred_element_type=jnp.float32)
    h2 = acc + b2_ref[...]
    a2 = lrelu(group_norm(h2, g2_ref, be2_ref))          # (midc, HW)

    # ---- conv3 (1x1) + residual add + LeakyReLU ----------------------------
    h3 = jnp.dot(w3_ref[...], a2, preferred_element_type=jnp.float32) + b3_ref[...]
    o_ref[0] = lrelu(h3 + xs).astype(o_ref.dtype)


# ------------------------------- JAX wrapper -------------------------------- #

@jax.jit
def resblock_forward(x, params):
    """x: (N, inc, H, W) float32 -> (N, inc, H, W). Whole ResBlock in one kernel."""
    n, inc, h, w = x.shape
    midc = params["w1"].shape[0]
    gp = 16 if midc // 16 == 0 else 8          # mirrors the PyTorch constructor
    assert midc % gp == 0
    cpg = midc // gp
    hw = h * w

    pad_off = ((max(128, w + 1) + 127) // 128) * 128   # lane-aligned zero margin

    x2 = x.reshape(n, inc, hw).astype(jnp.float32)

    w1 = params["w1"].reshape(midc, inc).astype(jnp.float32)
    b1 = params["b1"].reshape(midc, 1).astype(jnp.float32)
    g1 = params["g1"].reshape(midc, 1).astype(jnp.float32)
    be1 = params["be1"].reshape(midc, 1).astype(jnp.float32)
    # (Cout, Cin, 3, 3) -> (tap=ky*3+kx, Cout, Cin)
    w2 = jnp.transpose(params["w2"], (2, 3, 0, 1)).reshape(9, midc, midc).astype(jnp.float32)
    b2 = params["b2"].reshape(midc, 1).astype(jnp.float32)
    g2 = params["g2"].reshape(midc, 1).astype(jnp.float32)
    be2 = params["be2"].reshape(midc, 1).astype(jnp.float32)
    w3 = params["w3"].reshape(inc, midc).astype(jnp.float32)
    b3 = params["b3"].reshape(inc, 1).astype(jnp.float32)

    grp = jnp.arange(midc) // cpg
    gmat = (grp[:, None] == grp[None, :]).astype(jnp.float32) / float(cpg * hw)

    col = jnp.arange(hw, dtype=jnp.int32) % w
    wmask = jnp.stack([(col >= 1), (col <= w - 2)], axis=0).astype(jnp.float32)

    kernel = functools.partial(_resblock_kernel, width=w, pad_off=pad_off,
                               slope=0.1, eps=1e-5)

    out = pl.pallas_call(
        kernel,
        out_shape=jax.ShapeDtypeStruct((n, inc, hw), jnp.float32),
        grid_spec=pltpu.PrefetchScalarGridSpec(
            num_scalar_prefetch=0,
            grid=(n,),
            in_specs=[
                pl.BlockSpec((1, inc, hw), lambda b: (b, 0, 0)),       # x
                pl.BlockSpec((midc, inc), lambda b: (0, 0)),           # w1
                pl.BlockSpec((midc, 1), lambda b: (0, 0)),             # b1
                pl.BlockSpec((midc, 1), lambda b: (0, 0)),             # gn1 gamma
                pl.BlockSpec((midc, 1), lambda b: (0, 0)),             # gn1 beta
                pl.BlockSpec((9, midc, midc), lambda b: (0, 0, 0)),    # w2 taps
                pl.BlockSpec((midc, 1), lambda b: (0, 0)),             # b2
                pl.BlockSpec((midc, 1), lambda b: (0, 0)),             # gn2 gamma
                pl.BlockSpec((midc, 1), lambda b: (0, 0)),             # gn2 beta
                pl.BlockSpec((inc, midc), lambda b: (0, 0)),           # w3
                pl.BlockSpec((inc, 1), lambda b: (0, 0)),              # b3
                pl.BlockSpec((midc, midc), lambda b: (0, 0)),          # group-avg matrix
                pl.BlockSpec((2, hw), lambda b: (0, 0)),               # column masks
            ],
            out_specs=pl.BlockSpec((1, inc, hw), lambda b: (b, 0, 0)),
            scratch_shapes=[pltpu.VMEM((midc, hw + 2 * pad_off), jnp.float32)],
        ),
        compiler_params=pltpu.CompilerParams(
            dimension_semantics=("parallel",)),
    )(x2, w1, b1, g1, be1, w2, b2, g2, be2, w3, b3, gmat, wmask)

    return out.reshape(n, inc, h, w)


# ----------------------------- pure-JAX reference ---------------------------- #

def resblock_ref(x, params):
    midc = params["w1"].shape[0]
    gp = 16 if midc // 16 == 0 else 8

    def lrelu(v):
        return jnp.where(v >= 0, v, 0.1 * v)

    def conv1x1(h, wgt, b):
        return jnp.einsum("nchw,oc->nohw", h, wgt[:, :, 0, 0]) + b[None, :, None, None]

    def conv3x3(h, wgt, b):
        y = jax.lax.conv_general_dilated(
            h, wgt, window_strides=(1, 1), padding=((1, 1), (1, 1)),
            dimension_numbers=("NCHW", "OIHW", "NCHW"))
        return y + b[None, :, None, None]

    def group_norm(h, gamma, beta, eps=1e-5):
        n, c, hh, ww = h.shape
        hg = h.reshape(n, gp, c // gp, hh, ww)
        mean = hg.mean(axis=(2, 3, 4), keepdims=True)
        var = ((hg - mean) ** 2).mean(axis=(2, 3, 4), keepdims=True)
        hn = ((hg - mean) / jnp.sqrt(var + eps)).reshape(n, c, hh, ww)
        return hn * gamma[None, :, None, None] + beta[None, :, None, None]

    h = lrelu(group_norm(conv1x1(x, params["w1"], params["b1"]), params["g1"], params["be1"]))
    h = lrelu(group_norm(conv3x3(h, params["w2"], params["b2"]), params["g2"], params["be2"]))
    h = conv1x1(h, params["w3"], params["b3"])
    return lrelu(h + x)


def init_params(key, inc, midc):
    ks = jax.random.split(key, 10)
    return {
        "w1": 0.1 * jax.random.normal(ks[0], (midc, inc, 1, 1), jnp.float32),
        "b1": 0.1 * jax.random.normal(ks[1], (midc,), jnp.float32),
        "g1": 1.0 + 0.1 * jax.random.normal(ks[2], (midc,), jnp.float32),
        "be1": 0.1 * jax.random.normal(ks[3], (midc,), jnp.float32),
        "w2": 0.1 * jax.random.normal(ks[4], (midc, midc, 3, 3), jnp.float32),
        "b2": 0.1 * jax.random.normal(ks[5], (midc,), jnp.float32),
        "g2": 1.0 + 0.1 * jax.random.normal(ks[6], (midc,), jnp.float32),
        "be2": 0.1 * jax.random.normal(ks[7], (midc,), jnp.float32),
        "w3": 0.1 * jax.random.normal(ks[8], (inc, midc, 1, 1), jnp.float32),
        "b3": 0.1 * jax.random.normal(ks[9], (inc,), jnp.float32),
    }


if __name__ == "__main__":
    N, inc, midc = 2, 4, 32
    H = W = 16

    key = jax.random.PRNGKey(0)
    kx, kp = jax.random.split(key)
    x = jax.random.normal(kx, (N, inc, H, W), jnp.float32)
    params = init_params(kp, inc, midc)

    out = resblock_forward(x, params)
    out = jax.block_until_ready(out)

    assert out.shape == (N, inc, H, W), out.shape
    assert bool(jnp.all(jnp.isfinite(out)))

    ref = resblock_ref(x, params)
    assert bool(jnp.allclose(out, ref, atol=5e-2, rtol=5e-2))

    print("KERNEL_OK")
</pallas_src>

<mosaic_0001>
module attributes {stable_mosaic.version = 11 : i64} {
  func.func @_resblock_kernel(%arg0: i32, %arg1: memref<1x4x256xf32, #tpu.memory_space<vmem>>, %arg2: memref<32x4xf32, #tpu.memory_space<vmem>>, %arg3: memref<32x1xf32, #tpu.memory_space<vmem>>, %arg4: memref<32x1xf32, #tpu.memory_space<vmem>>, %arg5: memref<32x1xf32, #tpu.memory_space<vmem>>, %arg6: memref<9x32x32xf32, #tpu.memory_space<vmem>>, %arg7: memref<32x1xf32, #tpu.memory_space<vmem>>, %arg8: memref<32x1xf32, #tpu.memory_space<vmem>>, %arg9: memref<32x1xf32, #tpu.memory_space<vmem>>, %arg10: memref<4x32xf32, #tpu.memory_space<vmem>>, %arg11: memref<4x1xf32, #tpu.memory_space<vmem>>, %arg12: memref<32x32xf32, #tpu.memory_space<vmem>>, %arg13: memref<2x256xf32, #tpu.memory_space<vmem>>, %arg14: memref<1x4x256xf32, #tpu.memory_space<vmem>>, %arg15: memref<32x512xf32, #tpu.memory_space<vmem>>) attributes {dimension_semantics = [#tpu.dimension_semantics<parallel>], iteration_bounds = array<i64: 2>, scalar_prefetch = 0 : i64, scratch_operands = 1 : i64, tpu.core_type = #tpu.core_type<tc>, window_params = [{transform_indices = @transform_0, window_bounds = array<i64: 1, 4, 256>}, {pipeline_mode = #tpu.pipeline_mode<synchronous>, transform_indices = @transform_1, window_bounds = array<i64: 32, 4>}, {pipeline_mode = #tpu.pipeline_mode<synchronous>, transform_indices = @transform_2, window_bounds = array<i64: 32, 1>}, {pipeline_mode = #tpu.pipeline_mode<synchronous>, transform_indices = @transform_3, window_bounds = array<i64: 32, 1>}, {pipeline_mode = #tpu.pipeline_mode<synchronous>, transform_indices = @transform_4, window_bounds = array<i64: 32, 1>}, {pipeline_mode = #tpu.pipeline_mode<synchronous>, transform_indices = @transform_5, window_bounds = array<i64: 9, 32, 32>}, {pipeline_mode = #tpu.pipeline_mode<synchronous>, transform_indices = @transform_6, window_bounds = array<i64: 32, 1>}, {pipeline_mode = #tpu.pipeline_mode<synchronous>, transform_indices = @transform_7, window_bounds = array<i64: 32, 1>}, {pipeline_mode = #tpu.pipeline_mode<synchronous>, transform_indices = @transform_8, window_bounds = array<i64: 32, 1>}, {pipeline_mode = #tpu.pipeline_mode<synchronous>, transform_indices = @transform_9, window_bounds = array<i64: 4, 32>}, {pipeline_mode = #tpu.pipeline_mode<synchronous>, transform_indices = @transform_10, window_bounds = array<i64: 4, 1>}, {pipeline_mode = #tpu.pipeline_mode<synchronous>, transform_indices = @transform_11, window_bounds = array<i64: 32, 32>}, {pipeline_mode = #tpu.pipeline_mode<synchronous>, transform_indices = @transform_12, window_bounds = array<i64: 2, 256>}, {transform_indices = @transform_13, window_bounds = array<i64: 1, 4, 256>}]} {
    %c0 = arith.constant 0 : index
    %c0_0 = arith.constant 0 : index
    %c0_1 = arith.constant 0 : index
    %0 = vector.load %arg1[%c0, %c0_0, %c0_1] : memref<1x4x256xf32, #tpu.memory_space<vmem>>, vector<1x4x256xf32>
    %1 = vector.shape_cast %0 : vector<1x4x256xf32> to vector<4x256xf32>
    %c0_2 = arith.constant 0 : index
    %c0_3 = arith.constant 0 : index
    %2 = vector.load %arg12[%c0_2, %c0_3] : memref<32x32xf32, #tpu.memory_space<vmem>>, vector<32x32xf32>
    %c0_4 = arith.constant 0 : index
    %c0_5 = arith.constant 0 : index
    %3 = vector.load %arg2[%c0_4, %c0_5] : memref<32x4xf32, #tpu.memory_space<vmem>>, vector<32x4xf32>
    %cst = arith.constant dense<0.000000e+00> : vector<32x256xf32>
    %4 = tpu.matmul %3, %1, %cst {dimension_numbers = #tpu.dot_dimension_numbers<[1], [0], [0], [1], [0, 0, 1, 1], [], []>} : vector<32x4xf32>, vector<4x256xf32>, vector<32x256xf32> -> vector<32x256xf32>
    %c0_6 = arith.constant 0 : index
    %c0_7 = arith.constant 0 : index
    %5 = vector.load %arg3[%c0_6, %c0_7] : memref<32x1xf32, #tpu.memory_space<vmem>>, vector<32x1xf32>
    %6 = vector.broadcast %5 : vector<32x1xf32> to vector<32x256xf32>
    %7 = arith.addf %4, %6 : vector<32x256xf32>
    %cst_8 = arith.constant dense<0.000000e+00> : vector<32x256xf32>
    %8 = tpu.matmul %2, %7, %cst_8 {dimension_numbers = #tpu.dot_dimension_numbers<[1], [0], [0], [1], [0, 0, 1, 1], [], []>} : vector<32x32xf32>, vector<32x256xf32>, vector<32x256xf32> -> vector<32x256xf32>
    %cst_9 = arith.constant dense<0.000000e+00> : vector<32xf32>
    %9 = vector.multi_reduction <add>, %8, %cst_9 [1] : vector<32x256xf32> to vector<32xf32>
    %10 = vector.shape_cast %9 : vector<32xf32> to vector<32x1xf32>
    %11 = vector.broadcast %10 : vector<32x1xf32> to vector<32x256xf32>
    %12 = arith.subf %7, %11 : vector<32x256xf32>
    %13 = arith.mulf %12, %12 : vector<32x256xf32>
    %cst_10 = arith.constant dense<0.000000e+00> : vector<32x256xf32>
    %14 = tpu.matmul %2, %13, %cst_10 {dimension_numbers = #tpu.dot_dimension_numbers<[1], [0], [0], [1], [0, 0, 1, 1], [], []>} : vector<32x32xf32>, vector<32x256xf32>, vector<32x256xf32> -> vector<32x256xf32>
    %cst_11 = arith.constant dense<0.000000e+00> : vector<32xf32>
    %15 = vector.multi_reduction <add>, %14, %cst_11 [1] : vector<32x256xf32> to vector<32xf32>
    %16 = vector.shape_cast %15 : vector<32xf32> to vector<32x1xf32>
    %cst_12 = arith.constant 9.99999974E-6 : f32
    %17 = vector.broadcast %cst_12 : f32 to vector<32x1xf32>
    %18 = arith.addf %16, %17 : vector<32x1xf32>
    %19 = math.rsqrt %18 : vector<32x1xf32>
    %20 = vector.broadcast %19 : vector<32x1xf32> to vector<32x256xf32>
    %21 = arith.mulf %12, %20 : vector<32x256xf32>
    %c0_13 = arith.constant 0 : index
    %c0_14 = arith.constant 0 : index
    %22 = vector.load %arg4[%c0_13, %c0_14] : memref<32x1xf32, #tpu.memory_space<vmem>>, vector<32x1xf32>
    %23 = vector.broadcast %22 : vector<32x1xf32> to vector<32x256xf32>
    %24 = arith.mulf %21, %23 : vector<32x256xf32>
    %c0_15 = arith.constant 0 : index
    %c0_16 = arith.constant 0 : index
    %25 = vector.load %arg5[%c0_15, %c0_16] : memref<32x1xf32, #tpu.memory_space<vmem>>, vector<32x1xf32>
    %26 = vector.broadcast %25 : vector<32x1xf32> to vector<32x256xf32>
    %27 = arith.addf %24, %26 : vector<32x256xf32>
    %cst_17 = arith.constant 0.000000e+00 : f32
    %28 = vector.broadcast %cst_17 : f32 to vector<32x256xf32>
    %29 = arith.cmpf oge, %27, %28 : vector<32x256xf32>
    %cst_18 = arith.constant 1.000000e-01 : f32
    %30 = vector.broadcast %cst_18 : f32 to vector<32x256xf32>
    %31 = arith.mulf %30, %27 : vector<32x256xf32>
    %32 = arith.select %29, %27, %31 : vector<32x256xi1>, vector<32x256xf32>
    %cst_19 = arith.constant 0.000000e+00 : f32
    %33 = vector.broadcast %cst_19 : f32 to vector<32x512xf32>
    %c0_20 = arith.constant 0 : index
    %c0_21 = arith.constant 0 : index
    %34 = vector.load %arg15[%c0_20, %c0_21] : memref<32x512xf32, #tpu.memory_space<vmem>>, vector<32x512xf32>
    tpu.vector_store %arg15[%c0_20, %c0_21], %33 {strides = array<i32>} : memref<32x512xf32, #tpu.memory_space<vmem>>, vector<32x512xf32>,
    %c0_22 = arith.constant 0 : index
    %c128 = arith.constant 128 : index
    %35 = vector.load %arg15[%c0_22, %c128] : memref<32x512xf32, #tpu.memory_space<vmem>>, vector<32x256xf32>
    tpu.vector_store %arg15[%c0_22, %c128], %32 {strides = array<i32>} : memref<32x512xf32, #tpu.memory_space<vmem>>, vector<32x256xf32>,
    %c0_23 = arith.constant 0 : index
    %c0_24 = arith.constant 0 : index
    %36 = vector.load %arg15[%c0_23, %c0_24] : memref<32x512xf32, #tpu.memory_space<vmem>>, vector<32x512xf32>
    %c0_25 = arith.constant 0 : index
    %c0_26 = arith.constant 0 : index
    %37 = vector.load %arg13[%c0_25, %c0_26] : memref<2x256xf32, #tpu.memory_space<vmem>>, vector<1x256xf32>
    %c1 = arith.constant 1 : index
    %c0_27 = arith.constant 0 : index
    %38 = vector.load %arg13[%c1, %c0_27] : memref<2x256xf32, #tpu.memory_space<vmem>>, vector<1x256xf32>
    %cst_28 = arith.constant 0.000000e+00 : f32
    %39 = vector.broadcast %cst_28 : f32 to vector<32x256xf32>
    %40 = vector.extract_strided_slice %36 {offsets = [0, 111], sizes = [32, 256], strides = [1, 1]} : vector<32x512xf32> to vector<32x256xf32>
    %41 = vector.broadcast %37 : vector<1x256xf32> to vector<32x256xf32>
    %42 = arith.mulf %40, %41 : vector<32x256xf32>
    %c0_29 = arith.constant 0 : index
    %c0_30 = arith.constant 0 : index
    %c0_31 = arith.constant 0 : index
    %43 = vector.load %arg6[%c0_29, %c0_30, %c0_31] : memref<9x32x32xf32, #tpu.memory_space<vmem>>, vector<1x32x32xf32>
    %44 = vector.shape_cast %43 : vector<1x32x32xf32> to vector<32x32xf32>
    %cst_32 = arith.constant dense<0.000000e+00> : vector<32x256xf32>
    %45 = tpu.matmul %44, %42, %cst_32 {dimension_numbers = #tpu.dot_dimension_numbers<[1], [0], [0], [1], [0, 0, 1, 1], [], []>} : vector<32x32xf32>, vector<32x256xf32>, vector<32x256xf32> -> vector<32x256xf32>
    %46 = arith.addf %39, %45 : vector<32x256xf32>
    %47 = vector.extract_strided_slice %36 {offsets = [0, 112], sizes = [32, 256], strides = [1, 1]} : vector<32x512xf32> to vector<32x256xf32>
    %c1_33 = arith.constant 1 : index
    %c0_34 = arith.constant 0 : index
    %c0_35 = arith.constant 0 : index
    %48 = vector.load %arg6[%c1_33, %c0_34, %c0_35] : memref<9x32x32xf32, #tpu.memory_space<vmem>>, vector<1x32x32xf32>
    %49 = vector.shape_cast %48 : vector<1x32x32xf32> to vector<32x32xf32>
    %cst_36 = arith.constant dense<0.000000e+00> : vector<32x256xf32>
    %50 = tpu.matmul %49, %47, %cst_36 {dimension_numbers = #tpu.dot_dimension_numbers<[1], [0], [0], [1], [0, 0, 1, 1], [], []>} : vector<32x32xf32>, vector<32x256xf32>, vector<32x256xf32> -> vector<32x256xf32>
    %51 = arith.addf %46, %50 : vector<32x256xf32>
    %52 = vector.extract_strided_slice %36 {offsets = [0, 113], sizes = [32, 256], strides = [1, 1]} : vector<32x512xf32> to vector<32x256xf32>
    %53 = vector.broadcast %38 : vector<1x256xf32> to vector<32x256xf32>
    %54 = arith.mulf %52, %53 : vector<32x256xf32>
    %c2 = arith.constant 2 : index
    %c0_37 = arith.constant 0 : index
    %c0_38 = arith.constant 0 : index
    %55 = vector.load %arg6[%c2, %c0_37, %c0_38] : memref<9x32x32xf32, #tpu.memory_space<vmem>>, vector<1x32x32xf32>
    %56 = vector.shape_cast %55 : vector<1x32x32xf32> to vector<32x32xf32>
    %cst_39 = arith.constant dense<0.000000e+00> : vector<32x256xf32>
    %57 = tpu.matmul %56, %54, %cst_39 {dimension_numbers = #tpu.dot_dimension_numbers<[1], [0], [0], [1], [0, 0, 1, 1], [], []>} : vector<32x32xf32>, vector<32x256xf32>, vector<32x256xf32> -> vector<32x256xf32>
    %58 = arith.addf %51, %57 : vector<32x256xf32>
    %59 = vector.extract_strided_slice %36 {offsets = [0, 127], sizes = [32, 256], strides = [1, 1]} : vector<32x512xf32> to vector<32x256xf32>
    %60 = vector.broadcast %37 : vector<1x256xf32> to vector<32x256xf32>
    %61 = arith.mulf %59, %60 : vector<32x256xf32>
    %c3 = arith.constant 3 : index
    %c0_40 = arith.constant 0 : index
    %c0_41 = arith.constant 0 : index
    %62 = vector.load %arg6[%c3, %c0_40, %c0_41] : memref<9x32x32xf32, #tpu.memory_space<vmem>>, vector<1x32x32xf32>
    %63 = vector.shape_cast %62 : vector<1x32x32xf32> to vector<32x32xf32>
    %cst_42 = arith.constant dense<0.000000e+00> : vector<32x256xf32>
    %64 = tpu.matmul %63, %61, %cst_42 {dimension_numbers = #tpu.dot_dimension_numbers<[1], [0], [0], [1], [0, 0, 1, 1], [], []>} : vector<32x32xf32>, vector<32x256xf32>, vector<32x256xf32> -> vector<32x256xf32>
    %65 = arith.addf %58, %64 : vector<32x256xf32>
    %66 = vector.extract_strided_slice %36 {offsets = [0, 128], sizes = [32, 256], strides = [1, 1]} : vector<32x512xf32> to vector<32x256xf32>
    %c4 = arith.constant 4 : index
    %c0_43 = arith.constant 0 : index
    %c0_44 = arith.constant 0 : index
    %67 = vector.load %arg6[%c4, %c0_43, %c0_44] : memref<9x32x32xf32, #tpu.memory_space<vmem>>, vector<1x32x32xf32>
    %68 = vector.shape_cast %67 : vector<1x32x32xf32> to vector<32x32xf32>
    %cst_45 = arith.constant dense<0.000000e+00> : vector<32x256xf32>
    %69 = tpu.matmul %68, %66, %cst_45 {dimension_numbers = #tpu.dot_dimension_numbers<[1], [0], [0], [1], [0, 0, 1, 1], [], []>} : vector<32x32xf32>, vector<32x256xf32>, vector<32x256xf32> -> vector<32x256xf32>
    %70 = arith.addf %65, %69 : vector<32x256xf32>
    %71 = vector.extract_strided_slice %36 {offsets = [0, 129], sizes = [32, 256], strides = [1, 1]} : vector<32x512xf32> to vector<32x256xf32>
    %72 = vector.broadcast %38 : vector<1x256xf32> to vector<32x256xf32>
    %73 = arith.mulf %71, %72 : vector<32x256xf32>
    %c5 = arith.constant 5 : index
    %c0_46 = arith.constant 0 : index
    %c0_47 = arith.constant 0 : index
    %74 = vector.load %arg6[%c5, %c0_46, %c0_47] : memref<9x32x32xf32, #tpu.memory_space<vmem>>, vector<1x32x32xf32>
    %75 = vector.shape_cast %74 : vector<1x32x32xf32> to vector<32x32xf32>
    %cst_48 = arith.constant dense<0.000000e+00> : vector<32x256xf32>
    %76 = tpu.matmul %75, %73, %cst_48 {dimension_numbers = #tpu.dot_dimension_numbers<[1], [0], [0], [1], [0, 0, 1, 1], [], []>} : vector<32x32xf32>, vector<32x256xf32>, vector<32x256xf32> -> vector<32x256xf32>
    %77 = arith.addf %70, %76 : vector<32x256xf32>
    %78 = vector.extract_strided_slice %36 {offsets = [0, 143], sizes = [32, 256], strides = [1, 1]} : vector<32x512xf32> to vector<32x256xf32>
    %79 = vector.broadcast %37 : vector<1x256xf32> to vector<32x256xf32>
    %80 = arith.mulf %78, %79 : vector<32x256xf32>
    %c6 = arith.constant 6 : index
    %c0_49 = arith.constant 0 : index
    %c0_50 = arith.constant 0 : index
    %81 = vector.load %arg6[%c6, %c0_49, %c0_50] : memref<9x32x32xf32, #tpu.memory_space<vmem>>, vector<1x32x32xf32>
    %82 = vector.shape_cast %81 : vector<1x32x32xf32> to vector<32x32xf32>
    %cst_51 = arith.constant dense<0.000000e+00> : vector<32x256xf32>
    %83 = tpu.matmul %82, %80, %cst_51 {dimension_numbers = #tpu.dot_dimension_numbers<[1], [0], [0], [1], [0, 0, 1, 1], [], []>} : vector<32x32xf32>, vector<32x256xf32>, vector<32x256xf32> -> vector<32x256xf32>
    %84 = arith.addf %77, %83 : vector<32x256xf32>
    %85 = vector.extract_strided_slice %36 {offsets = [0, 144], sizes = [32, 256], strides = [1, 1]} : vector<32x512xf32> to vector<32x256xf32>
    %c7 = arith.constant 7 : index
    %c0_52 = arith.constant 0 : index
    %c0_53 = arith.constant 0 : index
    %86 = vector.load %arg6[%c7, %c0_52, %c0_53] : memref<9x32x32xf32, #tpu.memory_space<vmem>>, vector<1x32x32xf32>
    %87 = vector.shape_cast %86 : vector<1x32x32xf32> to vector<32x32xf32>
    %cst_54 = arith.constant dense<0.000000e+00> : vector<32x256xf32>
    %88 = tpu.matmul %87, %85, %cst_54 {dimension_numbers = #tpu.dot_dimension_numbers<[1], [0], [0], [1], [0, 0, 1, 1], [], []>} : vector<32x32xf32>, vector<32x256xf32>, vector<32x256xf32> -> vector<32x256xf32>
    %89 = arith.addf %84, %88 : vector<32x256xf32>
    %90 = vector.extract_strided_slice %36 {offsets = [0, 145], sizes = [32, 256], strides = [1, 1]} : vector<32x512xf32> to vector<32x256xf32>
    %91 = vector.broadcast %38 : vector<1x256xf32> to vector<32x256xf32>
    %92 = arith.mulf %90, %91 : vector<32x256xf32>
    %c8 = arith.constant 8 : index
    %c0_55 = arith.constant 0 : index
    %c0_56 = arith.constant 0 : index
    %93 = vector.load %arg6[%c8, %c0_55, %c0_56] : memref<9x32x32xf32, #tpu.memory_space<vmem>>, vector<1x32x32xf32>
    %94 = vector.shape_cast %93 : vector<1x32x32xf32> to vector<32x32xf32>
    %cst_57 = arith.constant dense<0.000000e+00> : vector<32x256xf32>
    %95 = tpu.matmul %94, %92, %cst_57 {dimension_numbers = #tpu.dot_dimension_numbers<[1], [0], [0], [1], [0, 0, 1, 1], [], []>} : vector<32x32xf32>, vector<32x256xf32>, vector<32x256xf32> -> vector<32x256xf32>
    %96 = arith.addf %89, %95 : vector<32x256xf32>
    %c0_58 = arith.constant 0 : index
    %c0_59 = arith.constant 0 : index
    %97 = vector.load %arg7[%c0_58, %c0_59] : memref<32x1xf32, #tpu.memory_space<vmem>>, vector<32x1xf32>
    %98 = vector.broadcast %97 : vector<32x1xf32> to vector<32x256xf32>
    %99 = arith.addf %96, %98 : vector<32x256xf32>
    %cst_60 = arith.constant dense<0.000000e+00> : vector<32x256xf32>
    %100 = tpu.matmul %2, %99, %cst_60 {dimension_numbers = #tpu.dot_dimension_numbers<[1], [0], [0], [1], [0, 0, 1, 1], [], []>} : vector<32x32xf32>, vector<32x256xf32>, vector<32x256xf32> -> vector<32x256xf32>
    %cst_61 = arith.constant dense<0.000000e+00> : vector<32xf32>
    %101 = vector.multi_reduction <add>, %100, %cst_61 [1] : vector<32x256xf32> to vector<32xf32>
    %102 = vector.shape_cast %101 : vector<32xf32> to vector<32x1xf32>
    %103 = vector.broadcast %102 : vector<32x1xf32> to vector<32x256xf32>
    %104 = arith.subf %99, %103 : vector<32x256xf32>
    %105 = arith.mulf %104, %104 : vector<32x256xf32>
    %cst_62 = arith.constant dense<0.000000e+00> : vector<32x256xf32>
    %106 = tpu.matmul %2, %105, %cst_62 {dimension_numbers = #tpu.dot_dimension_numbers<[1], [0], [0], [1], [0, 0, 1, 1], [], []>} : vector<32x32xf32>, vector<32x256xf32>, vector<32x256xf32> -> vector<32x256xf32>
    %cst_63 = arith.constant dense<0.000000e+00> : vector<32xf32>
    %107 = vector.multi_reduction <add>, %106, %cst_63 [1] : vector<32x256xf32> to vector<32xf32>
    %108 = vector.shape_cast %107 : vector<32xf32> to vector<32x1xf32>
    %cst_64 = arith.constant 9.99999974E-6 : f32
    %109 = vector.broadcast %cst_64 : f32 to vector<32x1xf32>
    %110 = arith.addf %108, %109 : vector<32x1xf32>
    %111 = math.rsqrt %110 : vector<32x1xf32>
    %112 = vector.broadcast %111 : vector<32x1xf32> to vector<32x256xf32>
    %113 = arith.mulf %104, %112 : vector<32x256xf32>
    %c0_65 = arith.constant 0 : index
    %c0_66 = arith.constant 0 : index
    %114 = vector.load %arg8[%c0_65, %c0_66] : memref<32x1xf32, #tpu.memory_space<vmem>>, vector<32x1xf32>
    %115 = vector.broadcast %114 : vector<32x1xf32> to vector<32x256xf32>
    %116 = arith.mulf %113, %115 : vector<32x256xf32>
    %c0_67 = arith.constant 0 : index
    %c0_68 = arith.constant 0 : index
    %117 = vector.load %arg9[%c0_67, %c0_68] : memref<32x1xf32, #tpu.memory_space<vmem>>, vector<32x1xf32>
    %118 = vector.broadcast %117 : vector<32x1xf32> to vector<32x256xf32>
    %119 = arith.addf %116, %118 : vector<32x256xf32>
    %cst_69 = arith.constant 0.000000e+00 : f32
    %120 = vector.broadcast %cst_69 : f32 to vector<32x256xf32>
    %121 = arith.cmpf oge, %119, %120 : vector<32x256xf32>
    %cst_70 = arith.constant 1.000000e-01 : f32
    %122 = vector.broadcast %cst_70 : f32 to vector<32x256xf32>
    %123 = arith.mulf %122, %119 : vector<32x256xf32>
    %124 = arith.select %121, %119, %123 : vector<32x256xi1>, vector<32x256xf32>
    %c0_71 = arith.constant 0 : index
    %c0_72 = arith.constant 0 : index
    %125 = vector.load %arg10[%c0_71, %c0_72] : memref<4x32xf32, #tpu.memory_space<vmem>>, vector<4x32xf32>
    %cst_73 = arith.constant dense<0.000000e+00> : vector<4x256xf32>
    %126 = tpu.matmul %125, %124, %cst_73 {dimension_numbers = #tpu.dot_dimension_numbers<[1], [0], [0], [1], [0, 0, 1, 1], [], []>} : vector<4x32xf32>, vector<32x256xf32>, vector<4x256xf32> -> vector<4x256xf32>
    %c0_74 = arith.constant 0 : index
    %c0_75 = arith.constant 0 : index
    %127 = vector.load %arg11[%c0_74, %c0_75] : memref<4x1xf32, #tpu.memory_space<vmem>>, vector<4x1xf32>
    %128 = vector.broadcast %127 : vector<4x1xf32> to vector<4x256xf32>
    %129 = arith.addf %126, %128 : vector<4x256xf32>
    %130 = arith.addf %129, %1 : vector<4x256xf32>
    %cst_76 = arith.constant 0.000000e+00 : f32
    %131 = vector.broadcast %cst_76 : f32 to vector<4x256xf32>
    %132 = arith.cmpf oge, %130, %131 : vector<4x256xf32>
    %cst_77 = arith.constant 1.000000e-01 : f32
    %133 = vector.broadcast %cst_77 : f32 to vector<4x256xf32>
    %134 = arith.mulf %133, %130 : vector<4x256xf32>
    %135 = arith.select %132, %130, %134 : vector<4x256xi1>, vector<4x256xf32>
    %c0_78 = arith.constant 0 : index
    %c0_79 = arith.constant 0 : index
    %c0_80 = arith.constant 0 : index
    %136 = vector.load %arg14[%c0_78, %c0_79, %c0_80] : memref<1x4x256xf32, #tpu.memory_space<vmem>>, vector<1x4x256xf32>
    %137 = vector.shape_cast %136 : vector<1x4x256xf32> to vector<4x256xf32>
    %138 = vector.shape_cast %135 : vector<4x256xf32> to vector<1x4x256xf32>
    tpu.vector_store %arg14[%c0_78, %c0_79, %c0_80], %138 {strides = array<i32>} : memref<1x4x256xf32, #tpu.memory_space<vmem>>, vector<1x4x256xf32>,
    return
  }
  func.func @transform_0(%arg0: i32) -> (i32, i32, i32) {
    %c0_i32 = arith.constant 0 : i32
    %c0_i32_0 = arith.constant 0 : i32
    %c0_i32_1 = arith.constant 0 : i32
    return %arg0, %c0_i32, %c0_i32_0 : i32, i32, i32
  }
  func.func @transform_1(%arg0: i32) -> (i32, i32) {
    %c0_i32 = arith.constant 0 : i32
    %c0_i32_0 = arith.constant 0 : i32
    %c0_i32_1 = arith.constant 0 : i32
    return %c0_i32, %c0_i32_0 : i32, i32
  }
  func.func @transform_2(%arg0: i32) -> (i32, i32) {
    %c0_i32 = arith.constant 0 : i32
    %c0_i32_0 = arith.constant 0 : i32
    %c0_i32_1 = arith.constant 0 : i32
    return %c0_i32, %c0_i32_0 : i32, i32
  }
  func.func @transform_3(%arg0: i32) -> (i32, i32) {
    %c0_i32 = arith.constant 0 : i32
    %c0_i32_0 = arith.constant 0 : i32
    %c0_i32_1 = arith.constant 0 : i32
    return %c0_i32, %c0_i32_0 : i32, i32
  }
  func.func @transform_4(%arg0: i32) -> (i32, i32) {
    %c0_i32 = arith.constant 0 : i32
    %c0_i32_0 = arith.constant 0 : i32
    %c0_i32_1 = arith.constant 0 : i32
    return %c0_i32, %c0_i32_0 : i32, i32
  }
  func.func @transform_5(%arg0: i32) -> (i32, i32, i32) {
    %c0_i32 = arith.constant 0 : i32
    %c0_i32_0 = arith.constant 0 : i32
    %c0_i32_1 = arith.constant 0 : i32
    %c0_i32_2 = arith.constant 0 : i32
    return %c0_i32, %c0_i32_0, %c0_i32_1 : i32, i32, i32
  }
  func.func @transform_6(%arg0: i32) -> (i32, i32) {
    %c0_i32 = arith.constant 0 : i32
    %c0_i32_0 = arith.constant 0 : i32
    %c0_i32_1 = arith.constant 0 : i32
    return %c0_i32, %c0_i32_0 : i32, i32
  }
  func.func @transform_7(%arg0: i32) -> (i32, i32) {
    %c0_i32 = arith.constant 0 : i32
    %c0_i32_0 = arith.constant 0 : i32
    %c0_i32_1 = arith.constant 0 : i32
    return %c0_i32, %c0_i32_0 : i32, i32
  }
  func.func @transform_8(%arg0: i32) -> (i32, i32) {
    %c0_i32 = arith.constant 0 : i32
    %c0_i32_0 = arith.constant 0 : i32
    %c0_i32_1 = arith.constant 0 : i32
    return %c0_i32, %c0_i32_0 : i32, i32
  }
  func.func @transform_9(%arg0: i32) -> (i32, i32) {
    %c0_i32 = arith.constant 0 : i32
    %c0_i32_0 = arith.constant 0 : i32
    %c0_i32_1 = arith.constant 0 : i32
    return %c0_i32, %c0_i32_0 : i32, i32
  }
  func.func @transform_10(%arg0: i32) -> (i32, i32) {
    %c0_i32 = arith.constant 0 : i32
    %c0_i32_0 = arith.constant 0 : i32
    %c0_i32_1 = arith.constant 0 : i32
    return %c0_i32, %c0_i32_0 : i32, i32
  }
  func.func @transform_11(%arg0: i32) -> (i32, i32) {
    %c0_i32 = arith.constant 0 : i32
    %c0_i32_0 = arith.constant 0 : i32
    %c0_i32_1 = arith.constant 0 : i32
    return %c0_i32, %c0_i32_0 : i32, i32
  }
  func.func @transform_12(%arg0: i32) -> (i32, i32) {
    %c0_i32 = arith.constant 0 : i32
    %c0_i32_0 = arith.constant 0 : i32
    %c0_i32_1 = arith.constant 0 : i32
    return %c0_i32, %c0_i32_0 : i32, i32
  }
  func.func @transform_13(%arg0: i32) -> (i32, i32, i32) {
    %c0_i32 = arith.constant 0 : i32
    %c0_i32_0 = arith.constant 0 : i32
    %c0_i32_1 = arith.constant 0 : i32
    return %arg0, %c0_i32, %c0_i32_0 : i32, i32, i32
  }
}

</mosaic_0001>

<bundles_post_ra>
// kernel: resblock_forward.1
= control target key start
LH: loop header
LB: loop body
LE: loop exit
PB: predicated region body
PF: predicated region fallthrough
CT: control target
= control target key end

     0   :  { %18 = vsyncpa [#allocation4], 0  ;;  %s3210_s25 = smov 0   ;;  %s3959_s0 = inlined_call_operand.vmem [shape: f32[2,4,256], index: 0, kind: input, shape index: {}]   ;;  %s3960_s1 = inlined_call_operand.vmem [shape: f32[32,4], index: 1, kind: input, shape index: {}]   ;;  %s3961_s2 = inlined_call_operand.vmem [shape: f32[32,1], index: 2, kind: input, shape index: {}]   ;;  %s3962_s3 = inlined_call_operand.vmem [shape: f32[32,1], index: 3, kind: input, shape index: {}]   ;;  %s3963_s4 = inlined_call_operand.vmem [shape: f32[32,1], index: 4, kind: input, shape index: {}]   ;;  %s3964_s5 = inlined_call_operand.hbm [shape: f32[9,32,32], index: 5, kind: input, shape index: {}]   ;;  %s3965_s6 = inlined_call_operand.vmem [shape: f32[32,1], index: 6, kind: input, shape index: {}]   ;;  %s3966_s7 = inlined_call_operand.vmem [shape: f32[32,1], index: 7, kind: input, shape index: {}]   ;;  %s3967_s8 = inlined_call_operand.vmem [shape: f32[32,1], index: 8, kind: input, shape index: {}]   ;;  %s3968_s9 = inlined_call_operand.vmem [shape: f32[4,32], index: 9, kind: input, shape index: {}]   ;;  %s3969_s10 = inlined_call_operand.vmem [shape: f32[4,1], index: 10, kind: input, shape index: {}]   ;;  %s3970_s11 = inlined_call_operand.vmem [shape: f32[32,32], index: 11, kind: input, shape index: {}]   ;;  %s3971_s12 = inlined_call_operand.vmem [shape: f32[2,256], index: 12, kind: input, shape index: {}]   ;;  %s3972_s13 = inlined_call_operand.vmem [shape: f32[2,4,256], index: 13, kind: output, shape index: {}]  }
   0x1 LB: > { %s356_s28 = sshll.u32 %s3964_s5, 4  ;;  %s2659_s29 = sadd.s32 4294967295, %s3125_s25   ;;  %s3125_s25 = sphi %s3210_s25, %s24_s25   ;;  %s357_s28 = int_to_ptr.hbm [resolvable:$true] %s356_s28 }
   0x2   : > { %p2661_p0 = scmp.ge.s32.totalorder %s3125_s25, 1  ;;  %p333_p1 = scmp.lt.s32.totalorder %s3125_s25, 3 }
   0x3   : > { %p2799_p2 = scmp.eq.s32.totalorder %s2659_s29, 0  ;;  %s3127_s30 = smov [#allocation3]  }
   0x4   : > { %p334_p3 = pnand %p2661_p0, %p333_p1  ;;  %s358_s14 = sshll.u32 %s3127_s30, 4  ;;  %s359_s14 = int_to_ptr.vmem [resolvable:$true] %s358_s14 }
   0x5   : > { %s3128_s15 = smov 128   ;;  %s3129_s16 = smov 8  }
   0x6   : > { %p2795_p4 = pneg %p334_p3  ;;  %403 = sbr.rel (%p334_p3) target bundleno = 2084 (0x824), region = 72 }
   0x8   : > { %p2796_p5 = pnand %p2799_p2, %p2795_p4 }
   0xa   : > { %2798 = dma.hbm_to_vmem [thread:$0]  (!%p2796_p5), %s357_s28, 4608, %s359_s14, [#allocation4], %s3128_s15, %s3128_s15, %s3129_s16  }
   0xb   : > { %3120 = dma.done.wait (%p2799_p2), [#allocation4], 4608  }
   0xc   : > { %3122 = vsyncadd (%p2799_p2), [#allocation4], 4294962688  ;;  %p448_p6 = scmp.lt.s32.totalorder %s2659_s29, 1  ;;  %v3130_v0 = vmov 0   ;;  %v468_v2 = vld [vmem:[%s3961_s2 + $0x8] sm:$0xff]  ;;  %v470_v3 = vld [vmem:[%s3961_s2 + $0x18] sm:$0xff] }
   0xd   : > { %2823 = vset.pattern.permute.xlu1 %v3130_v0  ;;  %2822 = vset.pattern.permute.xlu0 %v3130_v0  ;;  %vm508_vm0 = vcmask 1043456   ;;  %v463_v4 = vld [vmem:[%s3960_s1] sm:$0xff]  ;;  %vm495_vm1 = vcmask 31744   ;;  %v469_v6 = vld [vmem:[%s3961_s2 + $0x10] sm:$0xff]  ;;  %v464_v9 = vld [vmem:[%s3960_s1 + $0x8] sm:$0xff]  ;;  %vm571_vm2 = vcmask 261120  }
   0xe   : > { %s3974_s29 = smov (!%p448_p6, %s2659_s29), 1  ;;  %2824 = vset.pattern.permute.xlu2 %v3130_v0  ;;  %478 = vperm.xlu1 %2823, %v468_v2   ;;  %v467_v5 = vld [vmem:[%s3961_s2] sm:$0xff]  ;;  %v465_v10 = vld [vmem:[%s3960_s1 + $0x10] sm:$0xff]  ;;  %v466_v11 = vld [vmem:[%s3960_s1 + $0x18] sm:$0xff]  ;;  %s3131_s19 = smov 113  }
   0xf   : > { %s2789_s17 = sshll.u32 %s3974_s29, 3  ;;  %488 = vperm.xlu0 %2822, %v470_v3   ;;  %v3272_v32 = vld [vmem:[%s3970_s11] sm:$0xff]  ;;  %v3281_v33 = vld [vmem:[%s3970_s11 + $0x8] sm:$0xff]  ;;  %v3290_v34 = vld [vmem:[%s3970_s11 + $0x10] sm:$0xff]  ;;  %s3132_s22 = smov 111  }
  0x10   : > { %s452_s20 = scalar_lea.vmem %s3959_s0, %s2789_s17  ;;  %v3299_v35 = vld [vmem:[%s3970_s11 + $0x18] sm:$0xff]  ;;  %v794_v48 = vld [vmem:[%s3962_s3 + $0x10] sm:$0xff]  ;;  %v825_v50 = vld [vmem:[%s3963_s4 + $0x8] sm:$0xff]  ;;  %s3134_s26 = smov 16  }
  0x11   : > { %v458_v1 = vld [vmem:[%s452_s20] sm:$0xff]  ;;  %v827_v47 = vld [vmem:[%s3963_s4 + $0x18] sm:$0xff]  ;;  %v826_v51 = vld [vmem:[%s3963_s4 + $0x10] sm:$0xff]  ;;  %s3135_s27 = smov 127   ;;  %s3136_s28 = smov 15  }
  0x12   : > { %492 = vst [vmem:[#allocation1] ss:$2 sm:$0xff] %v458_v1  ;;  %v824_v52 = vld [vmem:[%s3963_s4] sm:$0xff]  ;;  %s3137_s30 = smov 17   ;;  %s3138_s14 = smov 1  }
  0x13   : > { %s3139_s15 = smov 112  }
  0x16   : > { %473 = vperm.xlu1 %2823, %v467_v5  }
  0x17   : > { %483 = vperm.xlu0 %2822, %v469_v6  }
  0x19   : > { %v493_v7 = vld.sshfl [vmem:[#allocation1] sm:$0xff pattern:$0x75316420]  ;;  %v494_v8 = vld.sshfl [vmem:[#allocation1 + $0x8] sm:$0xff pattern:$0x75316420] }
  0x1a   : > { %2670 = vmatpush.msk.msra.mxu0 %vm508_vm0, %v493_v7  ;;  %2675 = vmatpush.msk.msra.mxu1 %vm508_vm0, %v494_v8  ;;  %2573 = vst [vmem:[#allocation1] ss:$2 sm:$0xff] %v458_v1  ;;  %v795_v1 = vld [vmem:[%s3962_s3 + $0x18] sm:$0xff] }
  0x1b   : > { %2671 = vmatmul.msk.f32.vlgmr.msra.gmra.mxu0 %vm495_vm1, %v463_v4  ;;  %2676 = vmatmul.msk.f32.vlgmr.msra.gmra.mxu1 %vm495_vm1, %v463_v4 }
  0x23   : > { %2672 = vmatmul.msk.f32.gmra.mxu0 %vm495_vm1, %v464_v9  ;;  %2677 = vmatmul.msk.f32.gmra.mxu1 %vm495_vm1, %v464_v9 }
  0x2b   : > { %2673 = vmatmul.msk.f32.gmra.mxu0 %vm495_vm1, %v465_v10  ;;  %2678 = vmatmul.msk.f32.gmra.mxu1 %vm495_vm1, %v465_v10  ;;  %v793_v10 = vld [vmem:[%s3962_s3 + $0x8] sm:$0xff] }
  0x33   : > { %2674 = vmatmul.msk.f32.gmra.mxu0 %vm495_vm1, %v466_v11  ;;  %2679 = vmatmul.msk.f32.gmra.mxu1 %vm495_vm1, %v466_v11  ;;  %v2696_v11 = vld [vmem:[%s3971_s12 + $0x1] ss:$2 sm:$0x3] }
  0x80   : > { %v479_v19 = vpop.permute.xlu1 %478 }
  0x81   : > { %v489_v16 = vpop.permute.xlu0 %488 }
  0x88   : > { %v474_v27 = vpop.permute.xlu1 %473 }
  0x89   : > { %v484_v20 = vpop.permute.xlu0 %483 }
  0x98   : > { %v530_v12 = vpop.f32.mrf.mxu0  ;;  %v559_v13 = vpop.f32.mrf.mxu1 }
  0x99   : > { %v531_v30 = vadd.f32 %v530_v12, %v474_v27  ;;  %v560_v31 = vadd.f32 %v559_v13, %v474_v27  ;;  %v3379_v12 = vperm.slane %v2696_v11, 1  ;;  %v792_v27 = vld [vmem:[%s3962_s3] sm:$0xff] }
  0xa0   : > { %v533_v14 = vpop.f32.mrf.mxu0  ;;  %v562_v15 = vpop.f32.mrf.mxu1 }
  0xa1   : > { %v534_v28 = vadd.f32 %v533_v14, %v479_v19  ;;  %v563_v29 = vadd.f32 %v562_v15, %v479_v19 }
  0xa8   : > { %v536_v17 = vpop.f32.mrf.mxu0  ;;  %v565_v18 = vpop.f32.mrf.mxu1 }
  0xa9   : > { %v3263_v25 = vadd.f32 %v536_v17, %v484_v20  ;;  %v3265_v26 = vadd.f32 %v565_v18, %v484_v20 }
  0xb0   : > { %v539_v21 = vpop.f32.mrf.mxu0  ;;  %v568_v22 = vpop.f32.mrf.mxu1 }
  0xb1   : > { %v540_v23 = vadd.f32 %v539_v21, %v489_v16  ;;  %v569_v24 = vadd.f32 %v568_v22, %v489_v16  ;;  %v920_v22 = vld [vmem:[%s3971_s12] ss:$2 sm:$0x3] }
  0xb3   : > { %596 = vmatpush.msra.mxu2 %v540_v23  ;;  %625 = vmatpush.msra.mxu3 %v569_v24 }
  0xb5   : > { %597 = vmatpush.msra.mxu2 %v3263_v25  ;;  %626 = vmatpush.msra.mxu3 %v3265_v26 }
  0xb7   : > { %598 = vmatpush.msra.mxu2 %v534_v28  ;;  %627 = vmatpush.msra.mxu3 %v563_v29 }
  0xb9   : > { %599 = vmatpush.msra.mxu2 %v531_v30  ;;  %628 = vmatpush.msra.mxu3 %v560_v31 }
  0xba   : > { %2680 = vmatmul.msk.f32.vlgmr.msra.gmra.mxu2 %vm571_vm2, %v3272_v32  ;;  %2684 = vmatmul.msk.f32.vlgmr.msra.gmra.mxu3 %vm571_vm2, %v3272_v32 }
  0xc2   : > { %2681 = vmatmul.msk.f32.gmra.mxu2 %vm571_vm2, %v3281_v33  ;;  %2685 = vmatmul.msk.f32.gmra.mxu3 %vm571_vm2, %v3281_v33 }
  0xca   : > { %2682 = vmatmul.msk.f32.gmra.mxu2 %vm571_vm2, %v3290_v34  ;;  %2686 = vmatmul.msk.f32.gmra.mxu3 %vm571_vm2, %v3290_v34 }
  0xd2   : > { %2683 = vmatmul.msk.f32.gmra.mxu2 %vm571_vm2, %v3299_v35  ;;  %2687 = vmatmul.msk.f32.gmra.mxu3 %vm571_vm2, %v3299_v35 }
 0x13d   : > { %v601_v36 = vpop.f32.mrf.mxu2  ;;  %v630_v37 = vpop.f32.mrf.mxu3 }
 0x13e   : > { %v642_v38 = vadd.f32 %v630_v37, %v601_v36 }
 0x140   : > { %643 = vadd.xlane.f32.xlu1 %v642_v38 }
 0x145   : > { %v604_v39 = vpop.f32.mrf.mxu2  ;;  %v633_v40 = vpop.f32.mrf.mxu3 }
 0x146   : > { %v645_v41 = vadd.f32 %v633_v40, %v604_v39 }
 0x148   : > { %646 = vadd.xlane.f32.xlu0 %v645_v41 }
 0x14d   : > { %v607_v42 = vpop.f32.mrf.mxu2  ;;  %v636_v43 = vpop.f32.mrf.mxu3 }
 0x14e   : > { %v648_v49 = vadd.f32 %v636_v43, %v607_v42 }
 0x155   : > { %v610_v44 = vpop.f32.mrf.mxu2  ;;  %v639_v45 = vpop.f32.mrf.mxu3 }
 0x156   : > { %v651_v46 = vadd.f32 %v639_v45, %v610_v44 }
 0x158   : > { %652 = vadd.xlane.f32.xlu2 %v651_v46 }
 0x159   : > { %845 = vperm.xlu1 %2823, %v827_v47  }
 0x15c   : > { %808 = vperm.xlu0 %2822, %v794_v48  }
 0x160   : > { %649 = vadd.xlane.f32.xlu2 %v648_v49 }
 0x161   : > { %835 = vperm.xlu1 %2823, %v825_v50  }
 0x164   : > { %840 = vperm.xlu0 %2822, %v826_v51  }
 0x169   : > { %1207 = vrot.lane.b32.xlu1 %v3379_v12, %s3131_s19 }
 0x16c   : > { %830 = vperm.xlu0 %2822, %v824_v52  }
 0x178   : > { %813 = vperm.xlu2 %2824, %v795_v1  }
 0x180   : > { %803 = vperm.xlu2 %2824, %v793_v10  }
 0x1b3   : > { %v644_v59 = vpop.xlane.xlu1 %643 }
 0x1b4   : > { %v3341_v2 = vsub.f32 %v531_v30, %v644_v59  ;;  %v3343_v3 = vsub.f32 %v560_v31, %v644_v59 }
 0x1b6   : > { %v662_v8 = vmul.f32 %v3341_v2, %v3341_v2  ;;  %v663_v9 = vmul.f32 %v3343_v3, %v3343_v3 }
 0x1bb   : > { %v647_v58 = vpop.xlane.xlu0 %646 }
 0x1bc   : > { %v3328_v61 = vsub.f32 %v534_v28, %v647_v58  ;;  %v3330_v62 = vsub.f32 %v563_v29, %v647_v58  ;;  %v3393_v28 = vperm.slane %v2696_v11, 0  ;;  %v3397_v29 = vperm.slane %v920_v22, 1 }
 0x1be   : > { %v664_v6 = vmul.f32 %v3328_v61, %v3328_v61  ;;  %v665_v7 = vmul.f32 %v3330_v62, %v3330_v62 }
 0x1cb   : > { %v653_v53 = vpop.xlane.xlu2 %652  ;;  %v3405_v44 = vpop.permute.xlu1 %845 }
 0x1cc   : > { %v3320_v54 = vsub.f32 %v540_v23, %v653_v53  ;;  %v3322_v55 = vsub.f32 %v569_v24, %v653_v53  ;;  %v3386_v23 = vperm.slane %v920_v22, 0 }
 0x1ce   : > { %v668_v56 = vmul.f32 %v3320_v54, %v3320_v54  ;;  %v669_v57 = vmul.f32 %v3322_v55, %v3322_v55  ;;  %926 = vrot.lane.b32.xlu0 %v3386_v23, %s3132_s22  ;;  %v809_v46 = vpop.permute.xlu0 %808 }
 0x1d0   : > { %682 = vmatpush.msrb.mxu0 %v668_v56  ;;  %711 = vmatpush.msrb.mxu1 %v669_v57 }
 0x1d3   : > { %v650_v60 = vpop.xlane.xlu2 %649 }
 0x1d4   : > { %v3333_v63 = vsub.f32 %v3263_v25, %v650_v60  ;;  %v3336_v0 = vsub.f32 %v3265_v26, %v650_v60 }
 0x1d6   : > { %v666_v4 = vmul.f32 %v3333_v63, %v3333_v63  ;;  %v667_v5 = vmul.f32 %v3336_v0, %v3336_v0 }
 0x1d8   : > { %683 = vmatpush.msrb.mxu0 %v666_v4  ;;  %712 = vmatpush.msrb.mxu1 %v667_v5  ;;  %v3409_v5 = vpop.permute.xlu1 %835 }
 0x1da   : > { %684 = vmatpush.msrb.mxu0 %v664_v6  ;;  %713 = vmatpush.msrb.mxu1 %v665_v7 }
 0x1db   : > { %v3401_v30 = vpop.permute.xlu2 %813 }
 0x1dc   : > { %685 = vmatpush.msrb.mxu0 %v662_v8  ;;  %714 = vmatpush.msrb.mxu1 %v663_v9  ;;  %v841_v8 = vpop.permute.xlu0 %840 }
 0x1dd   : > { %2688 = vmatmul.msk.f32.vlgmr.msrb.gmra.mxu0 %vm571_vm2, %v3272_v32  ;;  %2692 = vmatmul.msk.f32.vlgmr.msrb.gmra.mxu1 %vm571_vm2, %v3272_v32 }
 0x1e3   : > { %v3403_v31 = vpop.permute.xlu2 %803 }
 0x1e5   : > { %2689 = vmatmul.msk.f32.gmra.mxu0 %vm571_vm2, %v3281_v33  ;;  %2693 = vmatmul.msk.f32.gmra.mxu1 %vm571_vm2, %v3281_v33 }
 0x1ed   : > { %2690 = vmatmul.msk.f32.gmra.mxu0 %vm571_vm2, %v3290_v34  ;;  %2694 = vmatmul.msk.f32.gmra.mxu1 %vm571_vm2, %v3290_v34 }
 0x1f5   : > { %2691 = vmatmul.msk.f32.gmra.mxu0 %vm571_vm2, %v3299_v35  ;;  %2695 = vmatmul.msk.f32.gmra.mxu1 %vm571_vm2, %v3299_v35 }
 0x25a   : > { %v687_v13 = vpop.f32.mrf.mxu0  ;;  %v716_v14 = vpop.f32.mrf.mxu1 }
 0x25b   : > { %v728_v15 = vadd.f32 %v716_v14, %v687_v13 }
 0x25d   : > { %729 = vadd.xlane.f32.xlu2 %v728_v15 }
 0x262   : > { %v690_v16 = vpop.f32.mrf.mxu0  ;;  %v719_v17 = vpop.f32.mrf.mxu1 }
 0x263   : > { %v731_v18 = vadd.f32 %v719_v17, %v690_v16 }
 0x265   : > { %732 = vadd.xlane.f32.xlu2 %v731_v18 }
 0x26a   : > { %v693_v19 = vpop.f32.mrf.mxu0  ;;  %v722_v20 = vpop.f32.mrf.mxu1 }
 0x26b   : > { %v734_v21 = vadd.f32 %v722_v20, %v693_v19 }
 0x26d   : > { %735 = vadd.xlane.f32.xlu2 %v734_v21 }
 0x272   : > { %v696_v24 = vpop.f32.mrf.mxu0  ;;  %v725_v25 = vpop.f32.mrf.mxu1 }
 0x273   : > { %v737_v26 = vadd.f32 %v725_v25, %v696_v24 }
 0x275   : > { %738 = vadd.xlane.f32.xlu2 %v737_v26  ;;  %v3133_v26 = vmov 0.0  }
 0x28d   : > { %798 = vperm.xlu2 %2824, %v792_v27  }
 0x295   : > { %1205 = vrot.lane.b32.xlu2 %v3393_v28, %s3131_s19 }
 0x29d   : > { %928 = vrot.lane.b32.xlu2 %v3397_v29, %s3132_s22 }
 0x2d0   : > { %v730_v32 = vpop.xlane.xlu2 %729 }
 0x2d1   : > { %v740_v33 = vadd.f32 1e-05, %v730_v32 }
 0x2d3   : > { %3065 = vrsqrt.f32 %v740_v33  ;;  %vm750_vm8 = vweird.f32 %v740_v33 }
 0x2d8   : > { %v733_v34 = vpop.xlane.xlu2 %732 }
 0x2d9   : > { %v741_v35 = vadd.f32 1e-05, %v733_v34  ;;  %v3066_v36 = vpop.eup %3065 }
 0x2da   : > { %v745_v37 = vmul.f32 %v3066_v36, %v740_v33  ;;  %vm751_vm6 = vweird.f32 %v3066_v36 }
 0x2db   : > { %3067 = vrsqrt.f32 %v741_v35  ;;  %vm760_vm4 = vweird.f32 %v741_v35  ;;  %vm752_vm9 = vmor %vm750_vm8, %vm751_vm6 }
 0x2dc   : > { %v746_v42 = vmul.f32 %v3066_v36, %v745_v37 }
 0x2de   : > { %v747_v47 = vmul.f32 0.5, %v746_v42 }
 0x2e0   : > { %v736_v38 = vpop.xlane.xlu2 %735  ;;  %v748_v56 = vsub.f32 1.5, %v747_v47 }
 0x2e1   : > { %v3068_v39 = vpop.eup %3067  ;;  %v742_v40 = vadd.f32 1e-05, %v736_v38 }
 0x2e2   : > { %v755_v41 = vmul.f32 %v3068_v39, %v741_v35  ;;  %vm761_vm3 = vweird.f32 %v3068_v39  ;;  %v749_v4 = vmul.f32 %v3066_v36, %v748_v56 }
 0x2e3   : > { %3069 = vrsqrt.f32 %v742_v40  ;;  %vm762_vm5 = vmor %vm760_vm4, %vm761_vm3  ;;  %vm770_vm10 = vweird.f32 %v742_v40 }
 0x2e4   : > { %v756_v43 = vmul.f32 %v3068_v39, %v755_v41  ;;  %v753_v13 = vsel %vm752_vm9, %v3066_v36, %v749_v4  ;;  %vm930_vm9 = vcmask 908288  }
 0x2e5   : > { %v784_v21 = vmul.f32 %v753_v13, %v3341_v2  ;;  %v785_v22 = vmul.f32 %v753_v13, %v3343_v3  ;;  %v831_v3 = vpop.permute.xlu0 %830 }
 0x2e6   : > { %v757_v45 = vmul.f32 0.5, %v756_v43 }
 0x2e8   : > { %v758_v48 = vsub.f32 1.5, %v757_v45  ;;  %v739_v49 = vpop.xlane.xlu2 %738 }
 0x2e9   : > { %v3070_v50 = vpop.eup %3069  ;;  %v743_v51 = vadd.f32 1e-05, %v739_v49 }
 0x2ea   : > { %v759_v52 = vmul.f32 %v3068_v39, %v758_v48  ;;  %v765_v53 = vmul.f32 %v3070_v50, %v742_v40  ;;  %vm771_vm7 = vweird.f32 %v3070_v50 }
 0x2eb   : > { %3071 = vrsqrt.f32 %v743_v51  ;;  %vm772_vm12 = vmor %vm770_vm10, %vm771_vm7  ;;  %vm780_vm14 = vweird.f32 %v743_v51  ;;  %vm1209_vm10 = vcmask 924672  }
 0x2ec   : > { %v763_v57 = vsel %vm762_vm5, %v3068_v39, %v759_v52  ;;  %v766_v58 = vmul.f32 %v3070_v50, %v765_v53 }
 0x2ed   : > { %v786_v59 = vmul.f32 %v763_v57, %v3328_v61 }
 0x2ee   : > { %v767_v60 = vmul.f32 0.5, %v766_v58 }
 0x2ef   : > { %v818_v1 = vmul.f32 %v3403_v31, %v786_v59 }
 0x2f0   : > { %v768_v6 = vsub.f32 1.5, %v767_v60  ;;  %v799_v19 = vpop.permute.xlu2 %798 }
 0x2f1   : > { %v3072_v7 = vpop.eup %3071  ;;  %v850_v9 = vadd.f32 %v3409_v5, %v818_v1  ;;  %v816_v33 = vmul.f32 %v799_v19, %v784_v21  ;;  %v817_v34 = vmul.f32 %v799_v19, %v785_v22 }
 0x2f2   : > { %v769_v10 = vmul.f32 %v3070_v50, %v768_v6  ;;  %v775_v11 = vmul.f32 %v3072_v7, %v743_v51  ;;  %vm781_vm13 = vweird.f32 %v3072_v7 }
 0x2f3   : > { %vm858_vm11 = vcmp.ge.f32.partialorder %v850_v9, 0.0  ;;  %v866_v61 = vmul.f32 0.1, %v850_v9  ;;  %vm782_vm3 = vmor %vm780_vm14, %vm781_vm13  ;;  %v848_v39 = vadd.f32 %v831_v3, %v816_v33  ;;  %v849_v40 = vadd.f32 %v831_v3, %v817_v34 }
 0x2f4   : > { %v773_v14 = vsel %vm772_vm12, %v3070_v50, %v769_v10  ;;  %v776_v15 = vmul.f32 %v3072_v7, %v775_v11  ;;  %vm992_vm12 = vcmask 130048   ;;  %vm1267_vm13 = vcmask 121856  }
 0x2f5   : > { %v3412_v16 = vsel %vm858_vm11, %v850_v9, %v866_v61  ;;  %v788_v17 = vmul.f32 %v773_v14, %v3333_v63  ;;  %v789_v18 = vmul.f32 %v773_v14, %v3336_v0  ;;  %v787_v0 = vmul.f32 %v763_v57, %v3330_v62 }
 0x2f6   : > { %v777_v20 = vmul.f32 0.5, %v776_v15  ;;  %v2825_v27 = vpack.i.bf16 %v3412_v16, %v3133_v26  ;;  %v864_v49 = vmul.f32 0.1, %v848_v39  ;;  %v865_v50 = vmul.f32 0.1, %v849_v40 }
 0x2f7   : > { %v820_v24 = vmul.f32 %v809_v46, %v788_v17  ;;  %v821_v25 = vmul.f32 %v809_v46, %v789_v18  ;;  %v819_v45 = vmul.f32 %v3403_v31, %v787_v0  ;;  %vm856_vm4 = vcmp.ge.f32.partialorder %v848_v39, 0.0 }
 0x2f8   : > { %v778_v32 = vsub.f32 1.5, %v777_v20  ;;  %2826 = vrot.lane.b32.xlu1 %v2825_v27, %s3134_s26  ;;  %vm857_vm5 = vcmp.ge.f32.partialorder %v849_v40, 0.0  ;;  %v3438_v56 = vsel %vm856_vm4, %v848_v39, %v864_v49  ;;  %vm1115_vm11 = vcmask 138240  }
 0x2f9   : > { %v852_v35 = vadd.f32 %v841_v8, %v820_v24  ;;  %v853_v63 = vadd.f32 %v841_v8, %v821_v25  ;;  %vm1366_vm14 = vcmask 1039360  }
 0x2fa   : > { %v779_v2 = vmul.f32 %v3072_v7, %v778_v32 }
 0x2fb   : > { %vm860_vm15 = vcmp.ge.f32.partialorder %v852_v35, 0.0  ;;  %vm861_vm1 = vcmp.ge.f32.partialorder %v853_v63, 0.0  ;;  %v868_v36 = vmul.f32 0.1, %v852_v35  ;;  %v869_v37 = vmul.f32 0.1, %v853_v63 }
 0x2fc   : > { %v783_v38 = vsel %vm782_vm3, %v3072_v7, %v779_v2  ;;  %v927_v7 = vpop.permute.xlu0 %926 }
 0x2fd   : > { %v3423_v41 = vsel %vm860_vm15, %v852_v35, %v868_v36  ;;  %v3425_v42 = vsel %vm861_vm1, %v853_v63, %v869_v37  ;;  %v790_v43 = vmul.f32 %v783_v38, %v3320_v54  ;;  %v791_v62 = vmul.f32 %v783_v38, %v3322_v55  ;;  %v1206_v55 = vpop.permute.xlu2 %1205 }
 0x2fe   : > { %v2830_v46 = vpack.i.bf16 %v3425_v42, %v3423_v41  ;;  %v851_v54 = vadd.f32 %v3409_v5, %v819_v45  ;;  %v1208_v5 = vpop.permute.xlu1 %1207  ;;  %v1214_v6 = vmul.f32 0.0, %v1206_v55  ;;  %v935_v25 = vmul.f32 0.0, %v927_v7 }
 0x2ff   : > { %v822_v47 = vmul.f32 %v3401_v30, %v790_v43  ;;  %v823_v48 = vmul.f32 %v3401_v30, %v791_v62  ;;  %v3440_v30 = vsel %vm857_vm5, %v849_v40, %v865_v50  ;;  %v1210_v13 = vsel %vm1209_vm10, %v1206_v55, %v1208_v5 }
 0x300   : > { %2831 = vrot.lane.b32.xlu2 %v2830_v46, %s3134_s26  ;;  %v867_v59 = vmul.f32 0.1, %v851_v54  ;;  %vm859_vm8 = vcmp.ge.f32.partialorder %v851_v54, 0.0  ;;  %v2850_v1 = vpack.i.bf16 %v3440_v30, %v3438_v56  ;;  %v1221_v20 = vmul.f32 %v1210_v13, %v3423_v41 }
 0x301   : > { %v854_v51 = vadd.f32 %v3405_v44, %v822_v47  ;;  %v855_v52 = vadd.f32 %v3405_v44, %v823_v48  ;;  %v1222_v21 = vmul.f32 %v1208_v5, %v3425_v42  ;;  %v1218_v34 = vmul.f32 %v1210_v13, %v3412_v16 }
 0x302   : > { %v3454_v4 = vsel %vm859_vm8, %v851_v54, %v867_v59  ;;  %v1215_v36 = vmul.f32 %v1210_v13, %v3438_v56  ;;  %v1216_v38 = vmul.f32 %v1208_v5, %v3440_v30  ;;  %vm1424_vm15 = vcmask 7168  }
 0x303   : > { %vm862_vm6 = vcmp.ge.f32.partialorder %v854_v51, 0.0  ;;  %vm863_vm7 = vcmp.ge.f32.partialorder %v855_v52, 0.0  ;;  %v870_v31 = vmul.f32 0.1, %v854_v51  ;;  %v871_v53 = vmul.f32 0.1, %v855_v52 }
 0x304   : > { %v1219_v9 = vmul.f32 %v1208_v5, %v3454_v4  ;;  %v2845_v10 = vpack.i.bf16 0.0, %v3454_v4  ;;  %v2855_v27 = vpack.i.bf16 %v1222_v21, %v1221_v20  ;;  %v2860_v0 = vpack.i.bf16 %v1218_v34, %v1214_v6 }
 0x305   : > { %v3442_v57 = vsel %vm862_vm6, %v854_v51, %v870_v31  ;;  %v3444_v58 = vsel %vm863_vm7, %v855_v52, %v871_v53  ;;  %v929_v8 = vpop.permute.xlu2 %928  ;;  %v2875_v39 = vpack.i.bf16 %v1216_v38, %v1215_v36  ;;  %vm1945_vm1 = vcmask 916480  }
 0x306   : > { %v2840_v44 = vpack.i.bf16 0.0, %v3444_v58  ;;  %v2835_v60 = vpack.i.bf16 %v3442_v57, %v3133_v26  ;;  %v931_v11 = vsel %vm930_vm9, %v927_v7, %v929_v8  ;;  %v2865_v61 = vpack.i.bf16 %v1214_v6, %v1219_v9 }
 0x307   : > { %v942_v14 = vmul.f32 %v931_v11, %v3423_v41  ;;  %v943_v15 = vmul.f32 %v929_v8, %v3425_v42  ;;  %v1224_v17 = vmul.f32 %v1210_v13, %v3442_v57  ;;  %v1225_v22 = vmul.f32 %v1208_v5, %v3444_v58 }
 0x308   : > { %2841 = vrot.lane.b32.xlu0 %v2840_v44, %s3134_s26  ;;  %2836 = vrot.lane.b32.xlu1 %v2835_v60, %s3134_s26  ;;  %v945_v24 = vmul.f32 %v931_v11, %v3442_v57  ;;  %v946_v35 = vmul.f32 %v929_v8, %v3444_v58  ;;  %v939_v63 = vmul.f32 %v931_v11, %v3412_v16 }
 0x309   : > { %2851 = vrot.lane.b32.xlu2 %v2850_v1, %s3134_s26  ;;  %v2870_v18 = vpack.i.bf16 %v943_v15, %v942_v14  ;;  %v2880_v19 = vpack.i.bf16 %v1224_v17, %v1214_v6  ;;  %v2885_v32 = vpack.i.bf16 %v1214_v6, %v1225_v22  ;;  %v940_v37 = vmul.f32 %v929_v8, %v3454_v4 }
 0x30a   : > { %v2890_v33 = vpack.i.bf16 %v945_v24, %v935_v25  ;;  %v2900_v2 = vpack.i.bf16 %v935_v25, %v946_v35  ;;  %v2895_v3 = vpack.i.bf16 %v939_v63, %v935_v25  ;;  %v936_v43 = vmul.f32 %v931_v11, %v3438_v56 }
 0x30b   : > { %v2905_v40 = vpack.i.bf16 %v935_v25, %v940_v37  ;;  %v937_v62 = vmul.f32 %v929_v8, %v3440_v30 }
 0x30d   : > { %v2910_v45 = vpack.i.bf16 %v937_v62, %v936_v43 }
 0x310   : > { %2846 = vrot.lane.b32.xlu0 %v2845_v10, %s3134_s26  ;;  %1362 = vrot.lane.b32.xlu1 %v3386_v23, %s3135_s27 }
 0x311   : > { %2866 = vrot.lane.b32.xlu2 %v2865_v61, %s3136_s28 }
 0x318   : > { %1364 = vrot.lane.b32.xlu0 %v3397_v29, %s3135_s27  ;;  %2871 = vrot.lane.b32.xlu1 %v2870_v18, %s3137_s30 }
 0x319   : > { %2881 = vrot.lane.b32.xlu2 %v2880_v19, %s3136_s28 }
 0x320   : > { %2856 = vrot.lane.b32.xlu0 %v2855_v27, %s3136_s28  ;;  %2886 = vrot.lane.b32.xlu1 %v2885_v32, %s3136_s28  ;;  %v952_v27 = vld [vmem:[#allocation3 + $0x20] sm:$0xff] }
 0x321   : > { %2891 = vrot.lane.b32.xlu2 %v2890_v33, %s3137_s30 }
 0x328   : > { %2861 = vrot.lane.b32.xlu0 %v2860_v0, %s3136_s28  ;;  %2901 = vrot.lane.b32.xlu1 %v2900_v2, %s3137_s30 }
 0x329   : > { %2896 = vrot.lane.b32.xlu2 %v2895_v3, %s3137_s30 }
 0x330   : > { %2876 = vrot.lane.b32.xlu0 %v2875_v39, %s3136_s28  ;;  %2906 = vrot.lane.b32.xlu1 %v2905_v40, %s3137_s30 }
 0x331   : > { %1757 = vrot.lane.b32.xlu2 %v3386_v23, %s3136_s28 }
 0x338   : > { %1759 = vrot.lane.b32.xlu1 %v3397_v29, %s3136_s28  ;;  %2911 = vrot.lane.b32.xlu0 %v2910_v45, %s3137_s30  ;;  %s457_s28 = scalar_lea.vmem %s3972_s13, %s2789_s17 }
 0x339   : > { %1604 = vrot.lane.b32.xlu2 %v3379_v12, %s3138_s14 }
 0x340   : > { %1602 = vrot.lane.b32.xlu0 %v3393_v28, %s3138_s14 }
 0x35a   : > { %v2832_v46 = vpop.permute.xlu2 %2831 }
 0x35b   : > { %v2834_v50 = vunpack.i.h.bf16 %v2832_v46  ;;  %v2833_v51 = vunpack.i.l.bf16 %v2832_v46 }
 0x35d   : > { %v998_v10 = vsel %vm992_vm12, %v2833_v51, %v2834_v50 }
 0x363   : > { %v2852_v47 = vpop.permute.xlu2 %2851 }
 0x364   : > { %v2854_v17 = vunpack.i.h.bf16 %v2852_v47  ;;  %v2853_v18 = vunpack.i.l.bf16 %v2852_v47 }
 0x366   : > { %v994_v25 = vsel %vm992_vm12, %v2853_v18, %v2854_v17 }
 0x36a   : > { %v2827_v48 = vpop.permute.xlu1 %2826 }
 0x36b   : > { %v3500_v23 = vpop.permute.xlu2 %2866  ;;  %v2829_v1 = vunpack.i.h.bf16 %v2827_v48  ;;  %v2828_v5 = vunpack.i.l.bf16 %v2827_v48 }
 0x36d   : > { %v995_v11 = vsel %vm992_vm12, %v2828_v5, %v2829_v1 }
 0x373   : > { %v3502_v49 = vpop.permute.xlu2 %2881 }
 0x374   : > { %v2884_v61 = vunpack.i.h.bf16 %v3502_v49  ;;  %v2883_v13 = vunpack.i.l.bf16 %v3502_v49 }
 0x376   : > { %v1274_v24 = vsel %vm1267_vm13, %v2883_v13, %v2884_v61 }
 0x37a   : > { %v2842_v52 = vpop.permute.xlu0 %2841  ;;  %v2837_v29 = vpop.permute.xlu1 %2836 }
 0x37b   : > { %v2844_v54 = vunpack.i.h.bf16 %v2842_v52  ;;  %v2843_v55 = vunpack.i.l.bf16 %v2842_v52  ;;  %v2839_v31 = vunpack.i.h.bf16 %v2837_v29  ;;  %v2838_v53 = vunpack.i.l.bf16 %v2837_v29  ;;  %v3504_v59 = vpop.permute.xlu2 %2891 }
 0x37c   : > { %v2894_v44 = vunpack.i.h.bf16 %v3504_v59  ;;  %v2893_v60 = vunpack.i.l.bf16 %v3504_v59 }
 0x37d   : > { %v999_v6 = vsel %vm992_vm12, %v2838_v53, %v2839_v31  ;;  %v1000_v7 = vsel %vm992_vm12, %v2839_v31, %v2843_v55  ;;  %v997_v9 = vsel %vm992_vm12, %v2844_v54, %v2833_v51 }
 0x37e   : > { %1033 = vmatpush.msrb.mxu2 %v999_v6  ;;  %1062 = vmatpush.msrb.mxu3 %v1000_v7  ;;  %v1122_v8 = vsel %vm1115_vm11, %v2893_v60, %v2894_v44  ;;  %v2868_v60 = vunpack.i.l.bf16 %v3500_v23 }
 0x37f   : > { %1156 = vmatpush.msra.mxu0 %v1122_v8 }
 0x380   : > { %1034 = vmatpush.msrb.mxu2 %v997_v9  ;;  %1063 = vmatpush.msrb.mxu3 %v998_v10 }
 0x382   : > { %v2847_v14 = vpop.permute.xlu0 %2846  ;;  %v1363_v15 = vpop.permute.xlu1 %1362  ;;  %1035 = vmatpush.msrb.mxu2 %v995_v11 }
 0x383   : > { %v2849_v19 = vunpack.i.h.bf16 %v2847_v14  ;;  %v2848_v20 = vunpack.i.l.bf16 %v2847_v14  ;;  %v1371_v32 = vmul.f32 0.0, %v1363_v15  ;;  %v2897_v53 = vpop.permute.xlu2 %2896 }
 0x384   : > { %v2899_v11 = vunpack.i.h.bf16 %v2897_v53 }
 0x385   : > { %v993_v21 = vsel %vm992_vm12, %v2849_v19, %v2853_v18  ;;  %v996_v22 = vsel %vm992_vm12, %v2829_v1, %v2848_v20 }
 0x386   : > { %1036 = vmatpush.msrb.mxu2 %v993_v21  ;;  %1064 = vmatpush.msrb.mxu3 %v996_v22  ;;  %v2869_v21 = vunpack.i.h.bf16 %v3500_v23 }
 0x387   : > { %2697 = vmatmul.msk.f32.vlgmr.msrb.gmra.mxu2 %vm571_vm2, %v952_v27 }
 0x388   : > { %1308 = vmatpush.msra.mxu2 %v1274_v24  ;;  %1065 = vmatpush.msrb.mxu3 %v994_v25 }
 0x389   : > { %2701 = vmatmul.msk.f32.vlgmr.msrb.gmra.mxu3 %vm571_vm2, %v952_v27 }
 0x38a   : > { %v1365_v33 = vpop.permute.xlu0 %1364  ;;  %v2872_v34 = vpop.permute.xlu1 %2871 }
 0x38b   : > { %v1367_v35 = vsel %vm1366_vm14, %v1363_v15, %v1365_v33  ;;  %v1376_v63 = vmul.f32 %v1365_v33, %v3454_v4  ;;  %v1379_v3 = vmul.f32 %v1365_v33, %v3425_v42  ;;  %v1382_v39 = vmul.f32 %v1365_v33, %v3444_v58 }
 0x38c   : > { %v1375_v0 = vmul.f32 %v1367_v35, %v3412_v16  ;;  %v1378_v2 = vmul.f32 %v1367_v35, %v3423_v41  ;;  %v1381_v62 = vmul.f32 %v1367_v35, %v3442_v57  ;;  %v1372_v45 = vmul.f32 %v1367_v35, %v3438_v56 }
 0x38d   : > { %v2925_v36 = vpack.i.bf16 %v1371_v32, %v1376_v63  ;;  %v1373_v46 = vmul.f32 %v1365_v33, %v3440_v30  ;;  %v2940_v29 = vpack.i.bf16 %v1371_v32, %v1382_v39  ;;  %v2873_v1 = vunpack.i.l.bf16 %v2872_v34 }
 0x38e   : > { %v2920_v37 = vpack.i.bf16 %v1375_v0, %v1371_v32  ;;  %v2915_v38 = vpack.i.bf16 %v1379_v3, %v1378_v2  ;;  %v2935_v54 = vpack.i.bf16 %v1381_v62, %v1371_v32  ;;  %v2874_v13 = vunpack.i.h.bf16 %v2872_v34 }
 0x38f   : > { %2926 = vrot.lane.b32.xlu0 %v2925_v36, %s3138_s14  ;;  %v2930_v55 = vpack.i.bf16 %v1373_v46, %v1372_v45  ;;  %v953_v46 = vld [vmem:[#allocation3 + $0x28] sm:$0xff] }
 0x390   : > { %2921 = vrot.lane.b32.xlu1 %v2920_v37, %s3138_s14  ;;  %2916 = vrot.lane.b32.xlu2 %v2915_v38, %s3138_s14  ;;  %v1121_v59 = vsel %vm1115_vm11, %v2873_v1, %v2874_v13 }
 0x391   : > { %2698 = vmatmul.msk.f32.gmra.mxu2 %vm571_vm2, %v953_v46  ;;  %2702 = vmatmul.msk.f32.gmra.mxu3 %vm571_vm2, %v953_v46 }
 0x392   : > { %v2857_v40 = vpop.permute.xlu0 %2856  ;;  %v2887_v43 = vpop.permute.xlu1 %2886 }
 0x393   : > { %v2858_v47 = vunpack.i.l.bf16 %v2857_v40  ;;  %v2889_v48 = vunpack.i.h.bf16 %v2887_v43  ;;  %v2888_v49 = vunpack.i.l.bf16 %v2887_v43  ;;  %v2859_v50 = vunpack.i.h.bf16 %v2857_v40 }
 0x395   : > { %v1272_v51 = vsel %vm1267_vm13, %v2889_v48, %v2858_v47  ;;  %v1275_v52 = vsel %vm1267_vm13, %v2884_v61, %v2888_v49  ;;  %v1273_v31 = vsel %vm1267_vm13, %v2858_v47, %v2859_v50  ;;  %v2898_v61 = vunpack.i.l.bf16 %v2897_v53 }
 0x396   : > { %1309 = vmatpush.msra.mxu2 %v1272_v51  ;;  %1337 = vmatpush.msra.mxu3 %v1275_v52 }
 0x397   : > { %2941 = vrot.lane.b32.xlu0 %v2940_v29, %s3138_s14  ;;  %v1118_v19 = vsel %vm1115_vm11, %v2898_v61, %v2899_v11 }
 0x398   : > { %2936 = vrot.lane.b32.xlu1 %v2935_v54, %s3138_s14  ;;  %2931 = vrot.lane.b32.xlu2 %v2930_v55, %s3138_s14 }
 0x399   : > { %1338 = vmatpush.msra.mxu3 %v1273_v31 }
 0x39a   : > { %v2862_v5 = vpop.permute.xlu0 %2861  ;;  %v2902_v6 = vpop.permute.xlu1 %2901 }
 0x39b   : > { %v2864_v7 = vunpack.i.h.bf16 %v2862_v5  ;;  %v2863_v8 = vunpack.i.l.bf16 %v2862_v5  ;;  %v2904_v9 = vunpack.i.h.bf16 %v2902_v6  ;;  %v2903_v10 = vunpack.i.l.bf16 %v2902_v6 }
 0x39d   : > { %v1120_v14 = vsel %vm1115_vm11, %v2904_v9, %v2873_v1  ;;  %v1123_v15 = vsel %vm1115_vm11, %v2894_v44, %v2903_v10  ;;  %v1270_v17 = vsel %vm1267_vm13, %v2863_v8, %v2864_v7  ;;  %v1271_v18 = vsel %vm1267_vm13, %v2864_v7, %v2868_v60 }
 0x39e   : > { %1157 = vmatpush.msra.mxu0 %v1120_v14  ;;  %1185 = vmatpush.msra.mxu1 %v1123_v15 }
 0x39f   : > { %1310 = vmatpush.msra.mxu2 %v1270_v17  ;;  %1339 = vmatpush.msra.mxu3 %v1271_v18  ;;  %v954_v18 = vld [vmem:[#allocation3 + $0x30] sm:$0xff] }
 0x3a0   : > { %2040 = vrot.lane.b32.xlu1 %v3393_v28, %s3137_s30  ;;  %2042 = vrot.lane.b32.xlu0 %v3379_v12, %s3137_s30  ;;  %v1758_v12 = vpop.permute.xlu2 %1757 }
 0x3a1   : > { %1158 = vmatpush.msra.mxu0 %v1118_v19  ;;  %1186 = vmatpush.msra.mxu1 %v1121_v59  ;;  %v1771_v35 = vmul.f32 %v1758_v12, %v3423_v41  ;;  %v1765_v63 = vmul.f32 %v1758_v12, %v3438_v56  ;;  %v1774_v52 = vmul.f32 %v1758_v12, %v3442_v57  ;;  %v955_v59 = vld [vmem:[#allocation3 + $0x38] sm:$0xff] }
 0x3a2   : > { %v2877_v44 = vpop.permute.xlu0 %2876  ;;  %v2907_v20 = vpop.permute.xlu1 %2906  ;;  %v1768_v29 = vmul.f32 %v1758_v12, %v3412_v16  ;;  %2699 = vmatmul.msk.f32.gmra.mxu2 %vm571_vm2, %v954_v18  ;;  %2703 = vmatmul.msk.f32.gmra.mxu3 %vm571_vm2, %v954_v18  ;;  %v3015_v19 = vpack.i.bf16 %v3444_v58, %v3442_v57  ;;  %v1523_v18 = vld [vmem:[#allocation3 + $0x98] sm:$0xff] }
 0x3a3   : > { %v2879_v22 = vunpack.i.h.bf16 %v2877_v44  ;;  %v2878_v24 = vunpack.i.l.bf16 %v2877_v44  ;;  %v2908_v25 = vunpack.i.l.bf16 %v2907_v20  ;;  %v2909_v23 = vunpack.i.h.bf16 %v2907_v20  ;;  %v947_v44 = vld [vmem:[#allocation3] sm:$0xff] }
 0x3a4   : > { %v1227_v20 = vld [vmem:[#allocation3 + $0x40] sm:$0xff] }
 0x3a5   : > { %v1119_v27 = vsel %vm1115_vm11, %v2899_v11, %v2908_v25  ;;  %v1268_v28 = vsel %vm1267_vm13, %v2869_v21, %v2878_v24  ;;  %v1269_v32 = vsel %vm1267_vm13, %v2878_v24, %v2879_v22  ;;  %v1228_v21 = vld [vmem:[#allocation3 + $0x48] sm:$0xff]  ;;  %v1229_v24 = vld [vmem:[#allocation3 + $0x50] sm:$0xff] }
 0x3a6   : > { %1187 = vmatpush.msra.mxu1 %v1119_v27  ;;  %1311 = vmatpush.msra.mxu2 %v1268_v28  ;;  %v948_v22 = vld [vmem:[#allocation3 + $0x8] sm:$0xff]  ;;  %v949_v25 = vld [vmem:[#allocation3 + $0x10] sm:$0xff]  ;;  %v1230_v27 = vld [vmem:[#allocation3 + $0x58] sm:$0xff] }
 0x3a7   : > { %1340 = vmatpush.msra.mxu3 %v1269_v32  ;;  %v950_v32 = vld [vmem:[#allocation3 + $0x18] sm:$0xff] }
 0x3a8   : > { %1548 = vmatpush.msrb.mxu2 %v3442_v57  ;;  %v1605_v45 = vpop.permute.xlu2 %1604 }
 0x3a9   : > { %1577 = vmatpush.msrb.mxu3 %v3444_v58  ;;  %v1612_v47 = vmul.f32 0.0, %v1605_v45 }
 0x3aa   : > { %1549 = vmatpush.msrb.mxu2 %v3423_v41  ;;  %v1760_v33 = vpop.permute.xlu1 %1759  ;;  %v2912_v34 = vpop.permute.xlu0 %2911  ;;  %2704 = vmatmul.msk.f32.gmra.mxu3 %vm571_vm2, %v955_v59 }
 0x3ab   : > { %1578 = vmatpush.msrb.mxu3 %v3425_v42  ;;  %v1761_v0 = vsel %vm1267_vm13, %v1758_v12, %v1760_v33  ;;  %v1767_v2 = vmul.f32 0.0, %v1760_v33  ;;  %v2914_v3 = vunpack.i.h.bf16 %v2912_v34  ;;  %v2913_v36 = vunpack.i.l.bf16 %v2912_v34  ;;  %2700 = vmatmul.msk.f32.gmra.mxu2 %vm571_vm2, %v955_v59  ;;  %v1520_v12 = vld [vmem:[#allocation3 + $0x80] sm:$0xff] }
 0x3ac   : > { %1550 = vmatpush.msrb.mxu2 %v3412_v16  ;;  %v1772_v37 = vmul.f32 %v1761_v0, %v3425_v42  ;;  %v1769_v48 = vmul.f32 %v1761_v0, %v3454_v4  ;;  %v1775_v49 = vmul.f32 %v1761_v0, %v3444_v58  ;;  %v1766_v1 = vmul.f32 %v1761_v0, %v3440_v30 }
 0x3ad   : > { %1579 = vmatpush.msrb.mxu3 %v3454_v4  ;;  %v1116_v38 = vsel %vm1115_vm11, %v2909_v23, %v2913_v36  ;;  %v1117_v39 = vsel %vm1115_vm11, %v2913_v36, %v2914_v3  ;;  %v2945_v40 = vpack.i.bf16 %v1771_v35, %v1767_v2  ;;  %v2965_v43 = vpack.i.bf16 %v1765_v63, %v1767_v2  ;;  %v1521_v35 = vld [vmem:[#allocation3 + $0x88] sm:$0xff] }
 0x3ae   : > { %1551 = vmatpush.msrb.mxu2 %v3438_v56  ;;  %1159 = vmatpush.msra.mxu0 %v1116_v38  ;;  %v2950_v62 = vpack.i.bf16 %v1767_v2, %v1772_v37  ;;  %v2980_v31 = vpack.i.bf16 %v1775_v49, %v1774_v52  ;;  %v2960_v53 = vpack.i.bf16 %v1769_v48, %v1768_v29 }
 0x3af   : > { %1580 = vmatpush.msrb.mxu3 %v3440_v30  ;;  %1188 = vmatpush.msra.mxu1 %v1117_v39  ;;  %v2975_v9 = vpack.i.bf16 %v1767_v2, %v1766_v1 }
 0x3b0   : > { %2946 = vrot.lane.b32.xlu1 %v2945_v40, %s3131_s19  ;;  %2966 = vrot.lane.b32.xlu2 %v2965_v43, %s3131_s19 }
 0x3b1   : > { %2951 = vrot.lane.b32.xlu0 %v2950_v62, %s3131_s19  ;;  %2705 = vmatmul.msk.f32.vlgmr.msra.gmra.mxu0 %vm571_vm2, %v947_v44  ;;  %v1522_v62 = vld [vmem:[#allocation3 + $0x90] sm:$0xff] }
 0x3b2   : > { %v1603_v50 = vpop.permute.xlu0 %1602  ;;  %2709 = vmatmul.msk.f32.vlgmr.msra.gmra.mxu1 %vm571_vm2, %v947_v44  ;;  %2717 = vmatmul.msk.f32.vlgmr.msra.gmra.mxu3 %vm571_vm2, %v1227_v20 }
 0x3b3   : > { %v1616_v51 = vmul.f32 %v1603_v50, %v3423_v41  ;;  %v1606_v55 = vsel %vm1424_vm15, %v1603_v50, %v1605_v45  ;;  %v1619_v6 = vmul.f32 %v1603_v50, %v3442_v57  ;;  %v1610_v10 = vmul.f32 %v1603_v50, %v3438_v56  ;;  %2713 = vmatmul.msk.f32.vlgmr.msra.gmra.mxu2 %vm571_vm2, %v1227_v20 }
 0x3b4   : > { %v1617_v60 = vmul.f32 %v1606_v55, %v3425_v42  ;;  %v1620_v5 = vmul.f32 %v1606_v55, %v3444_v58  ;;  %v1611_v11 = vmul.f32 %v1606_v55, %v3440_v30  ;;  %v1614_v61 = vmul.f32 %v1606_v55, %v3454_v4 }
 0x3b5   : > { %v2955_v54 = vpack.i.bf16 %v1616_v51, %v1612_v47  ;;  %v1613_v13 = vmul.f32 %v1603_v50, %v3412_v16  ;;  %v2995_v14 = vpack.i.bf16 %v1610_v10, %v1612_v47 }
 0x3b6   : > { %v2970_v7 = vpack.i.bf16 %v1612_v47, %v1617_v60  ;;  %v2985_v8 = vpack.i.bf16 %v1620_v5, %v1619_v6  ;;  %v3000_v17 = vpack.i.bf16 %v1612_v47, %v1611_v11  ;;  %v1384_v5 = vld [vmem:[#allocation3 + $0x60] sm:$0xff] }
 0x3b7   : > { %v2990_v15 = vpack.i.bf16 %v1614_v61, %v1613_v13 }
 0x3b8   : > { %2956 = vrot.lane.b32.xlu1 %v2955_v54, %s3135_s27  ;;  %2981 = vrot.lane.b32.xlu2 %v2980_v31, %s3131_s19 }
 0x3b9   : > { %2961 = vrot.lane.b32.xlu0 %v2960_v53, %s3131_s19  ;;  %2706 = vmatmul.msk.f32.gmra.mxu0 %vm571_vm2, %v948_v22 }
 0x3ba   : > { %2718 = vmatmul.msk.f32.gmra.mxu3 %vm571_vm2, %v1228_v21  ;;  %2710 = vmatmul.msk.f32.gmra.mxu1 %vm571_vm2, %v948_v22 }
 0x3bb   : > { %2714 = vmatmul.msk.f32.gmra.mxu2 %vm571_vm2, %v1228_v21  ;;  %v1385_v21 = vld [vmem:[#allocation3 + $0x68] sm:$0xff] }
 0x3c0   : > { %2971 = vrot.lane.b32.xlu1 %v2970_v7, %s3135_s27  ;;  %2986 = vrot.lane.b32.xlu2 %v2985_v8, %s3135_s27 }
 0x3c1   : > { %2976 = vrot.lane.b32.xlu0 %v2975_v9, %s3131_s19  ;;  %2707 = vmatmul.msk.f32.gmra.mxu0 %vm571_vm2, %v949_v25 }
 0x3c2   : > { %2719 = vmatmul.msk.f32.gmra.mxu3 %vm571_vm2, %v1229_v24  ;;  %2711 = vmatmul.msk.f32.gmra.mxu1 %vm571_vm2, %v949_v25 }
 0x3c3   : > { %2715 = vmatmul.msk.f32.gmra.mxu2 %vm571_vm2, %v1229_v24 }
 0x3c8   : > { %2996 = vrot.lane.b32.xlu1 %v2995_v14, %s3135_s27  ;;  %2991 = vrot.lane.b32.xlu2 %v2990_v15, %s3135_s27 }
 0x3c9   : > { %3001 = vrot.lane.b32.xlu0 %v3000_v17, %s3135_s27  ;;  %2708 = vmatmul.msk.f32.gmra.mxu0 %vm571_vm2, %v950_v32 }
 0x3ca   : > { %2720 = vmatmul.msk.f32.gmra.mxu3 %vm571_vm2, %v1230_v27  ;;  %2712 = vmatmul.msk.f32.gmra.mxu1 %vm571_vm2, %v950_v32 }
 0x3cb   : > { %2716 = vmatmul.msk.f32.gmra.mxu2 %vm571_vm2, %v1230_v27 }
 0x3d0   : > { %3016 = vrot.lane.b32.xlu2 %v3015_v19, %s3139_s15 }
 0x3d2   : > { %2733 = vmatmul.msk.f32.vlgmr.msrb.gmra.mxu3 %vm571_vm2, %v1520_v12 }
 0x3d3   : > { %2729 = vmatmul.msk.f32.vlgmr.msrb.gmra.mxu2 %vm571_vm2, %v1520_v12 }
 0x3da   : > { %2734 = vmatmul.msk.f32.gmra.mxu3 %vm571_vm2, %v1521_v35 }
 0x3db   : > { %2730 = vmatmul.msk.f32.gmra.mxu2 %vm571_vm2, %v1521_v35  ;;  %v1386_v35 = vld [vmem:[#allocation3 + $0x70] sm:$0xff] }
 0x3e2   : > { %2735 = vmatmul.msk.f32.gmra.mxu3 %vm571_vm2, %v1522_v62 }
 0x3e3   : > { %2731 = vmatmul.msk.f32.gmra.mxu2 %vm571_vm2, %v1522_v62 }
 0x3ea   : > { %v2917_v28 = vpop.permute.xlu2 %2916  ;;  %2736 = vmatmul.msk.f32.gmra.mxu3 %vm571_vm2, %v1523_v18 }
 0x3eb   : > { %v2919_v0 = vunpack.i.h.bf16 %v2917_v28  ;;  %v2918_v37 = vunpack.i.l.bf16 %v2917_v28  ;;  %2732 = vmatmul.msk.f32.gmra.mxu2 %vm571_vm2, %v1523_v18 }
 0x3ed   : > { %v1430_v29 = vsel %vm1424_vm15, %v2918_v37, %v2919_v0 }
 0x3f2   : > { %v2932_v33 = vpop.permute.xlu2 %2931 }
 0x3f3   : > { %v2934_v49 = vunpack.i.h.bf16 %v2932_v33  ;;  %v2933_v50 = vunpack.i.l.bf16 %v2932_v33 }
 0x3f5   : > { %v1426_v1 = vsel %vm1424_vm15, %v2933_v50, %v2934_v49 }
 0x401   : > { %v2927_v23 = vpop.permute.xlu0 %2926 }
 0x402   : > { %v2922_v34 = vpop.permute.xlu1 %2921  ;;  %v2928_v43 = vunpack.i.l.bf16 %v2927_v23  ;;  %v2929_v51 = vunpack.i.h.bf16 %v2927_v23 }
 0x403   : > { %v2924_v45 = vunpack.i.h.bf16 %v2922_v34  ;;  %v2923_v46 = vunpack.i.l.bf16 %v2922_v34 }
 0x404   : > { %v1425_v60 = vsel %vm1424_vm15, %v2929_v51, %v2933_v50  ;;  %v2198_v50 = vld [vmem:[%s3965_s6 + $0x18] sm:$0xff] }
 0x405   : > { %v1427_v54 = vsel %vm1424_vm15, %v2923_v46, %v2924_v45  ;;  %v1428_v55 = vsel %vm1424_vm15, %v2924_v45, %v2928_v43  ;;  %v1387_v46 = vld [vmem:[#allocation3 + $0x78] sm:$0xff] }
 0x409   : > { %v2942_v63 = vpop.permute.xlu0 %2941 }
 0x40a   : > { %v2943_v2 = vunpack.i.l.bf16 %v2942_v63  ;;  %v3628_v3 = vpop.permute.xlu2 %2966  ;;  %v2937_v36 = vpop.permute.xlu1 %2936  ;;  %v2944_v38 = vunpack.i.h.bf16 %v2942_v63 }
 0x40b   : > { %v2939_v39 = vunpack.i.h.bf16 %v2937_v36  ;;  %v2938_v40 = vunpack.i.l.bf16 %v2937_v36 }
 0x40c   : > { %v1429_v52 = vsel %vm1424_vm15, %v2944_v38, %v2918_v37  ;;  %v3035_v38 = vpack.i.bf16 0.0, %v3425_v42 }
 0x40d   : > { %v1431_v47 = vsel %vm1424_vm15, %v2938_v40, %v2939_v39  ;;  %v1432_v48 = vsel %vm1424_vm15, %v2939_v39, %v2943_v2  ;;  %v3050_v39 = vpack.i.bf16 %v3454_v4, %v3412_v16 }
 0x40e   : > { %1465 = vmatpush.msrb.mxu0 %v1431_v47  ;;  %1494 = vmatpush.msrb.mxu1 %v1432_v48  ;;  %v2968_v47 = vunpack.i.l.bf16 %v3628_v3 }
 0x410   : > { %1466 = vmatpush.msrb.mxu0 %v1429_v52  ;;  %1495 = vmatpush.msrb.mxu1 %v1430_v29  ;;  %v3055_v52 = vpack.i.bf16 %v3438_v56, %v3133_v26  ;;  %v3060_v29 = vpack.i.bf16 0.0, %v3440_v30 }
 0x412   : > { %v2982_v31 = vpop.permute.xlu2 %2981  ;;  %v2041_v53 = vpop.permute.xlu1 %2040  ;;  %1467 = vmatpush.msrb.mxu0 %v1427_v54  ;;  %1496 = vmatpush.msrb.mxu1 %v1428_v55 }
 0x413   : > { %v2984_v6 = vunpack.i.h.bf16 %v2982_v31  ;;  %v2983_v7 = vunpack.i.l.bf16 %v2982_v31  ;;  %v2043_v8 = vpop.permute.xlu0 %2042  ;;  %v2054_v9 = vmul.f32 %v2041_v53, %v3423_v41  ;;  %v2048_v10 = vmul.f32 %v2041_v53, %v3438_v56 }
 0x414   : > { %v2044_v11 = vsel %vm1115_vm11, %v2041_v53, %v2043_v8  ;;  %v2050_v61 = vmul.f32 0.0, %v2043_v8  ;;  %1468 = vmatpush.msrb.mxu0 %v1425_v60  ;;  %1497 = vmatpush.msrb.mxu1 %v1426_v1  ;;  %v2057_v20 = vmul.f32 %v2041_v53, %v3442_v57  ;;  %v2051_v27 = vmul.f32 %v2041_v53, %v3412_v16  ;;  %v1778_v8 = vld [vmem:[#allocation3 + $0xc0] sm:$0xff] }
 0x415   : > { %v2055_v13 = vmul.f32 %v2044_v11, %v3425_v42  ;;  %2721 = vmatmul.msk.f32.vlgmr.msrb.gmra.mxu0 %vm571_vm2, %v1384_v5  ;;  %v1824_v14 = vsel %vm1209_vm10, %v2983_v7, %v2984_v6  ;;  %2725 = vmatmul.msk.f32.vlgmr.msrb.gmra.mxu1 %vm571_vm2, %v1384_v5  ;;  %v2058_v59 = vmul.f32 %v2044_v11, %v3444_v58 }
 0x416   : > { %v3005_v15 = vpack.i.bf16 %v2054_v9, %v2050_v61  ;;  %v3030_v17 = vpack.i.bf16 %v2048_v10, %v2050_v61  ;;  %1858 = vmatpush.msra.mxu2 %v1824_v14  ;;  %v2052_v22 = vmul.f32 %v2044_v11, %v3454_v4  ;;  %v3020_v58 = vpack.i.bf16 %v3423_v41, %v3133_v26 }
 0x417   : > { %v3010_v19 = vpack.i.bf16 %v2050_v61, %v2055_v13  ;;  %v3045_v32 = vpack.i.bf16 %v2058_v59, %v2057_v20  ;;  %v2049_v63 = vmul.f32 %v2044_v11, %v3440_v30  ;;  %v2197_v11 = vld [vmem:[%s3965_s6 + $0x10] sm:$0xff]  ;;  %v2196_v13 = vld [vmem:[%s3965_s6 + $0x8] sm:$0xff] }
 0x418   : > { %3006 = vrot.lane.b32.xlu1 %v3005_v15, %s3132_s22  ;;  %3031 = vrot.lane.b32.xlu2 %v3030_v17, %s3132_s22  ;;  %v3025_v57 = vpack.i.bf16 %v2052_v22, %v2051_v27  ;;  %v1038_v22 = vpop.f32.mrf.mxu2  ;;  %v1623_v27 = vld [vmem:[#allocation3 + $0xa0] sm:$0xff] }
 0x419   : > { %3011 = vrot.lane.b32.xlu0 %v3010_v19, %s3132_s22  ;;  %v3040_v40 = vpack.i.bf16 %v2050_v61, %v2049_v63  ;;  %v1781_v63 = vld [vmem:[#allocation3 + $0xd8] sm:$0xff] }
 0x41a   : > { %v2987_v44 = vpop.permute.xlu2 %2986 }
 0x41b   : > { %v2989_v24 = vunpack.i.h.bf16 %v2987_v44  ;;  %v2988_v25 = vunpack.i.l.bf16 %v2987_v44 }
 0x41d   : > { %v1669_v28 = vsel %vm1366_vm14, %v2988_v25, %v2989_v24  ;;  %2722 = vmatmul.msk.f32.gmra.mxu0 %vm571_vm2, %v1385_v21  ;;  %2726 = vmatmul.msk.f32.gmra.mxu1 %vm571_vm2, %v1385_v21 }
 0x41e   : > { %1703 = vmatpush.msra.mxu0 %v1669_v28 }
 0x420   : > { %3021 = vrot.lane.b32.xlu1 %v3020_v58, %s3139_s15  ;;  %3046 = vrot.lane.b32.xlu2 %v3045_v32, %s3132_s22  ;;  %v1779_v32 = vld [vmem:[#allocation3 + $0xc8] sm:$0xff] }
 0x421   : > { %3026 = vrot.lane.b32.xlu0 %v3025_v57, %s3132_s22 }
 0x422   : > { %v2947_v12 = vpop.permute.xlu1 %2946  ;;  %v2992_v51 = vpop.permute.xlu2 %2991 }
 0x423   : > { %v2949_v23 = vunpack.i.h.bf16 %v2947_v12  ;;  %v2948_v33 = vunpack.i.l.bf16 %v2947_v12  ;;  %v2952_v34 = vpop.permute.xlu0 %2951  ;;  %v2994_v54 = vunpack.i.h.bf16 %v2992_v51  ;;  %v2993_v31 = vunpack.i.l.bf16 %v2992_v51  ;;  %v1624_v12 = vld [vmem:[#allocation3 + $0xa8] sm:$0xff] }
 0x424   : > { %v2954_v0 = vunpack.i.h.bf16 %v2952_v34  ;;  %v2953_v2 = vunpack.i.l.bf16 %v2952_v34  ;;  %v1780_v34 = vld [vmem:[#allocation3 + $0xd0] sm:$0xff] }
 0x425   : > { %v1825_v41 = vsel %vm1209_vm10, %v2984_v6, %v2948_v33  ;;  %2723 = vmatmul.msk.f32.gmra.mxu0 %vm571_vm2, %v1386_v35  ;;  %2727 = vmatmul.msk.f32.gmra.mxu1 %vm571_vm2, %v1386_v35  ;;  %v2969_v6 = vunpack.i.h.bf16 %v3628_v3  ;;  %v2195_v3 = vld [vmem:[%s3965_s6] sm:$0xff]  ;;  %v1665_v61 = vsel %vm1366_vm14, %v2993_v31, %v2994_v54  ;;  %v1625_v35 = vld [vmem:[#allocation3 + $0xb0] sm:$0xff] }
 0x426   : > { %1887 = vmatpush.msra.mxu3 %v1825_v41  ;;  %v1822_v36 = vsel %vm1209_vm10, %v2949_v23, %v2953_v2  ;;  %v1823_v37 = vsel %vm1209_vm10, %v2953_v2, %v2954_v0  ;;  %v1041_v23 = vpop.f32.mrf.mxu2  ;;  %v1626_v41 = vld [vmem:[#allocation3 + $0xb8] sm:$0xff] }
 0x427   : > { %1859 = vmatpush.msra.mxu2 %v1822_v36 }
 0x428   : > { %1888 = vmatpush.msra.mxu3 %v1823_v37  ;;  %3036 = vrot.lane.b32.xlu1 %v3035_v38, %s3139_s15 }
 0x429   : > { %3051 = vrot.lane.b32.xlu2 %v3050_v39, %s3139_s15  ;;  %3041 = vrot.lane.b32.xlu0 %v3040_v40, %s3132_s22 }
 0x42a   : > { %v2957_v43 = vpop.permute.xlu1 %2956  ;;  %v3706_v14 = vpop.permute.xlu2 %3016 }
 0x42b   : > { %v2958_v62 = vunpack.i.l.bf16 %v2957_v43  ;;  %v2962_v45 = vpop.permute.xlu0 %2961  ;;  %v2959_v53 = vunpack.i.h.bf16 %v2957_v43  ;;  %v3019_v59 = vunpack.i.h.bf16 %v3706_v14  ;;  %v3018_v44 = vunpack.i.l.bf16 %v3706_v14 }
 0x42c   : > { %v2964_v42 = vunpack.i.h.bf16 %v2962_v45  ;;  %v2963_v48 = vunpack.i.l.bf16 %v2962_v45 }
 0x42d   : > { %v1670_v16 = vsel %vm1366_vm14, %v2989_v24, %v2958_v62  ;;  %2724 = vmatmul.msk.f32.gmra.mxu0 %vm571_vm2, %v1387_v46  ;;  %2728 = vmatmul.msk.f32.gmra.mxu1 %vm571_vm2, %v1387_v46  ;;  %v1067_v24 = vpop.f32.mrf.mxu3  ;;  %v1952_v57 = vsel %vm1945_vm1, %v3018_v44, %v3019_v59 }
 0x42e   : > { %1732 = vmatpush.msra.mxu1 %v1670_v16  ;;  %v1820_v4 = vsel %vm1209_vm10, %v2963_v48, %v2964_v42  ;;  %v1821_v49 = vsel %vm1209_vm10, %v2964_v42, %v2968_v47  ;;  %v1044_v0 = vpop.f32.mrf.mxu2  ;;  %v1161_v38 = vpop.f32.mrf.mxu0 }
 0x42f   : > { %1860 = vmatpush.msra.mxu2 %v1820_v4  ;;  %1889 = vmatpush.msra.mxu3 %v1821_v49  ;;  %v1190_v39 = vpop.f32.mrf.mxu1  ;;  %v1162_v40 = vadd.f32 %v1161_v38, %v1038_v22 }
 0x430   : > { %3056 = vrot.lane.b32.xlu1 %v3055_v52, %s3139_s15  ;;  %v1191_v43 = vadd.f32 %v1190_v39, %v1067_v24 }
 0x431   : > { %2216 = vperm.xlu2 %2824, %v2198_v50   ;;  %3061 = vrot.lane.b32.xlu0 %v3060_v29, %s3139_s15 }
 0x432   : > { %v2972_v55 = vpop.permute.xlu1 %2971 }
 0x433   : > { %v2974_v60 = vunpack.i.h.bf16 %v2972_v55  ;;  %v2973_v1 = vunpack.i.l.bf16 %v2972_v55  ;;  %v2977_v5 = vpop.permute.xlu0 %2976 }
 0x434   : > { %v2979_v7 = vunpack.i.h.bf16 %v2977_v5  ;;  %v2978_v26 = vunpack.i.l.bf16 %v2977_v5 }
 0x435   : > { %v1667_v56 = vsel %vm1366_vm14, %v2959_v53, %v2973_v1  ;;  %v1668_v30 = vsel %vm1366_vm14, %v2973_v1, %v2974_v60  ;;  %v1070_v33 = vpop.f32.mrf.mxu3 }
 0x436   : > { %1704 = vmatpush.msra.mxu0 %v1667_v56  ;;  %1733 = vmatpush.msra.mxu1 %v1668_v30  ;;  %v1818_v9 = vsel %vm1209_vm10, %v2969_v6, %v2978_v26  ;;  %v1819_v10 = vsel %vm1209_vm10, %v2978_v26, %v2979_v7  ;;  %v1047_v36 = vpop.f32.mrf.mxu2  ;;  %v1164_v42 = vpop.f32.mrf.mxu0 }
 0x437   : > { %1861 = vmatpush.msra.mxu2 %v1818_v9  ;;  %1890 = vmatpush.msra.mxu3 %v1819_v10  ;;  %v1193_v48 = vpop.f32.mrf.mxu1  ;;  %v1165_v16 = vadd.f32 %v1164_v42, %v1041_v23 }
 0x438   : > { %1705 = vmatpush.msra.mxu0 %v1665_v61  ;;  %2745 = vmatmul.msk.f32.vlgmr.msra.gmra.mxu2 %vm571_vm2, %v1778_v8  ;;  %v1194_v4 = vadd.f32 %v1193_v48, %v1070_v33 }
 0x439   : > { %2211 = vperm.xlu1 %2823, %v2197_v11   ;;  %2201 = vperm.xlu2 %2824, %v2195_v3  }
 0x43a   : > { %2206 = vperm.xlu0 %2822, %v2196_v13   ;;  %v2997_v15 = vpop.permute.xlu1 %2996  ;;  %2749 = vmatmul.msk.f32.vlgmr.msra.gmra.mxu3 %vm571_vm2, %v1778_v8 }
 0x43b   : > { %v2999_v17 = vunpack.i.h.bf16 %v2997_v15  ;;  %v2998_v18 = vunpack.i.l.bf16 %v2997_v15  ;;  %v3002_v19 = vpop.permute.xlu0 %3001 }
 0x43c   : > { %v3004_v20 = vunpack.i.h.bf16 %v3002_v19  ;;  %v3003_v21 = vunpack.i.l.bf16 %v3002_v19 }
 0x43d   : > { %v1666_v25 = vsel %vm1366_vm14, %v2994_v54, %v2998_v18  ;;  %v1073_v2 = vpop.f32.mrf.mxu3 }
 0x43e   : > { %1734 = vmatpush.msra.mxu1 %v1666_v25  ;;  %v1663_v28 = vsel %vm1366_vm14, %v2999_v17, %v3003_v21  ;;  %v1664_v58 = vsel %vm1366_vm14, %v3003_v21, %v3004_v20  ;;  %v1313_v62 = vpop.f32.mrf.mxu2  ;;  %v1167_v29 = vpop.f32.mrf.mxu0 }
 0x43f   : > { %1706 = vmatpush.msra.mxu0 %v1663_v28  ;;  %v1354_v46 = vadd.f32 %v1313_v62, %v1162_v40  ;;  %v1196_v54 = vpop.f32.mrf.mxu1  ;;  %v1168_v55 = vadd.f32 %v1167_v29, %v1044_v0 }
 0x440   : > { %2737 = vmatmul.msk.f32.vlgmr.msra.gmra.mxu0 %vm571_vm2, %v1623_v27  ;;  %1735 = vmatpush.msra.mxu1 %v1664_v58  ;;  %v1197_v31 = vadd.f32 %v1196_v54, %v1073_v2 }
 0x441   : > { %1986 = vmatpush.msrb.mxu0 %v1952_v57  ;;  %2741 = vmatmul.msk.f32.vlgmr.msra.gmra.mxu1 %vm571_vm2, %v1623_v27 }
 0x442   : > { %2746 = vmatmul.msk.f32.gmra.mxu2 %vm571_vm2, %v1779_v32  ;;  %2750 = vmatmul.msk.f32.gmra.mxu3 %vm571_vm2, %v1779_v32 }
 0x445   : > { %v1076_v37 = vpop.f32.mrf.mxu3 }
 0x446   : > { %v1316_v49 = vpop.f32.mrf.mxu2  ;;  %v1170_v7 = vpop.f32.mrf.mxu0 }
 0x447   : > { %v3731_v51 = vadd.f32 %v1316_v49, %v1165_v16  ;;  %v1199_v26 = vpop.f32.mrf.mxu1  ;;  %v1171_v56 = vadd.f32 %v1170_v7, %v1047_v36 }
 0x448   : > { %2738 = vmatmul.msk.f32.gmra.mxu0 %vm571_vm2, %v1624_v12  ;;  %v1200_v30 = vadd.f32 %v1199_v26, %v1076_v37 }
 0x449   : > { %2742 = vmatmul.msk.f32.gmra.mxu1 %vm571_vm2, %v1624_v12 }
 0x44a   : > { %2747 = vmatmul.msk.f32.gmra.mxu2 %vm571_vm2, %v1780_v34  ;;  %2751 = vmatmul.msk.f32.gmra.mxu3 %vm571_vm2, %v1780_v34 }
 0x44d   : > { %v1342_v45 = vpop.f32.mrf.mxu3 }
 0x44e   : > { %v1355_v47 = vadd.f32 %v1342_v45, %v1191_v43  ;;  %v1319_v53 = vpop.f32.mrf.mxu2 }
 0x44f   : > { %v3735_v1 = vadd.f32 %v1319_v53, %v1168_v55 }
 0x450   : > { %2739 = vmatmul.msk.f32.gmra.mxu0 %vm571_vm2, %v1625_v35 }
 0x451   : > { %2743 = vmatmul.msk.f32.gmra.mxu1 %vm571_vm2, %v1625_v35 }
 0x452   : > { %2748 = vmatmul.msk.f32.gmra.mxu2 %vm571_vm2, %v1781_v63  ;;  %2752 = vmatmul.msk.f32.gmra.mxu3 %vm571_vm2, %v1781_v63 }
 0x455   : > { %v1345_v50 = vpop.f32.mrf.mxu3 }
 0x456   : > { %v3733_v52 = vadd.f32 %v1345_v50, %v1194_v4  ;;  %v1322_v8 = vpop.f32.mrf.mxu2 }
 0x457   : > { %v3741_v11 = vadd.f32 %v1322_v8, %v1171_v56 }
 0x458   : > { %2740 = vmatmul.msk.f32.gmra.mxu0 %vm571_vm2, %v1626_v41 }
 0x459   : > { %2744 = vmatmul.msk.f32.gmra.mxu1 %vm571_vm2, %v1626_v41 }
 0x45d   : > { %v1348_v60 = vpop.f32.mrf.mxu3 }
 0x45e   : > { %v3737_v5 = vadd.f32 %v1348_v60, %v1197_v31  ;;  %v1553_v27 = vpop.f32.mrf.mxu2  ;;  %v2061_v31 = vld [vmem:[#allocation3 + $0x100] sm:$0xff] }
 0x465   : > { %v1351_v9 = vpop.f32.mrf.mxu3 }
 0x466   : > { %v3743_v3 = vadd.f32 %v1351_v9, %v1200_v30  ;;  %v1556_v62 = vpop.f32.mrf.mxu2 }
 0x46d   : > { %v1582_v58 = vpop.f32.mrf.mxu3 }
 0x472   : > { %v3739_v6 = vpop.permute.xlu2 %3031 }
 0x473   : > { %v3033_v23 = vunpack.i.l.bf16 %v3739_v6  ;;  %v3034_v48 = vunpack.i.h.bf16 %v3739_v6 }
 0x475   : > { %v1585_v29 = vpop.f32.mrf.mxu3 }
 0x47a   : > { %v3047_v10 = vpop.permute.xlu2 %3046 }
 0x47b   : > { %v3049_v61 = vunpack.i.h.bf16 %v3047_v10  ;;  %v3048_v13 = vunpack.i.l.bf16 %v3047_v10 }
 0x47d   : > { %v2107_v15 = vsel %vm930_vm9, %v3048_v13, %v3049_v61 }
 0x47e   : > { %2141 = vmatpush.msrb.mxu2 %v2107_v15 }
 0x483   : > { %v3052_v38 = vpop.permute.xlu2 %3051 }
 0x484   : > { %v3054_v40 = vunpack.i.h.bf16 %v3052_v38  ;;  %v3053_v45 = vunpack.i.l.bf16 %v3052_v38 }
 0x48a   : > { %v3007_v17 = vpop.permute.xlu1 %3006 }
 0x48b   : > { %v3009_v18 = vunpack.i.h.bf16 %v3007_v17  ;;  %v3008_v19 = vunpack.i.l.bf16 %v3007_v17  ;;  %v3012_v44 = vpop.permute.xlu0 %3011 }
 0x48c   : > { %v3014_v20 = vunpack.i.h.bf16 %v3012_v44  ;;  %v3013_v21 = vunpack.i.l.bf16 %v3012_v44  ;;  %v1559_v44 = vpop.f32.mrf.mxu2 }
 0x48d   : > { %v2108_v22 = vsel %vm930_vm9, %v3049_v61, %v3008_v19 }
 0x48e   : > { %2170 = vmatpush.msrb.mxu3 %v2108_v22  ;;  %v2105_v24 = vsel %vm930_vm9, %v3009_v18, %v3013_v21  ;;  %v2106_v25 = vsel %vm930_vm9, %v3013_v21, %v3014_v20  ;;  %v1913_v18 = vld [vmem:[#allocation3 + $0xe0] sm:$0xff]  ;;  %v2062_v22 = vld [vmem:[#allocation3 + $0x108] sm:$0xff] }
 0x48f   : > { %2142 = vmatpush.msrb.mxu2 %v2105_v24 }
 0x490   : > { %2171 = vmatpush.msrb.mxu3 %v2106_v25  ;;  %v1588_v25 = vpop.f32.mrf.mxu3 }
 0x492   : > { %v3022_v28 = vpop.permute.xlu1 %3021  ;;  %v1470_v12 = vpop.f32.mrf.mxu0 }
 0x493   : > { %v3023_v32 = vunpack.i.l.bf16 %v3022_v28  ;;  %v3027_v57 = vpop.permute.xlu0 %3026  ;;  %v1511_v35 = vadd.f32 %v1470_v12, %v1354_v46  ;;  %v1499_v63 = vpop.f32.mrf.mxu1  ;;  %v3024_v14 = vunpack.i.h.bf16 %v3022_v28  ;;  %v1915_v28 = vld [vmem:[#allocation3 + $0xf0] sm:$0xff] }
 0x494   : > { %v3029_v33 = vunpack.i.h.bf16 %v3027_v57  ;;  %v3028_v34 = vunpack.i.l.bf16 %v3027_v57  ;;  %v1512_v2 = vadd.f32 %v1499_v63, %v1355_v47  ;;  %v1562_v57 = vpop.f32.mrf.mxu2 }
 0x495   : > { %v1953_v0 = vsel %vm1945_vm1, %v3019_v59, %v3023_v32  ;;  %v3755_v37 = vadd.f32 %v1553_v27, %v1511_v35  ;;  %v1916_v32 = vld [vmem:[#allocation3 + $0xf8] sm:$0xff] }
 0x496   : > { %2015 = vmatpush.msrb.mxu1 %v1953_v0  ;;  %v2103_v41 = vsel %vm930_vm9, %v3028_v34, %v3029_v33  ;;  %v2104_v36 = vsel %vm930_vm9, %v3029_v33, %v3033_v23  ;;  %v3757_v39 = vadd.f32 %v1582_v58, %v1512_v2  ;;  %v2064_v58 = vld [vmem:[#allocation3 + $0x118] sm:$0xff] }
 0x497   : > { %2143 = vmatpush.msrb.mxu2 %v2103_v41  ;;  %2172 = vmatpush.msrb.mxu3 %v2104_v36 }
 0x498   : > { %v1591_v12 = vpop.f32.mrf.mxu3 }
 0x49a   : > { %v3037_v43 = vpop.permute.xlu1 %3036  ;;  %v1473_v42 = vpop.f32.mrf.mxu0 }
 0x49b   : > { %v3039_v46 = vunpack.i.h.bf16 %v3037_v43  ;;  %v3038_v59 = vunpack.i.l.bf16 %v3037_v43  ;;  %v3042_v47 = vpop.permute.xlu0 %3041  ;;  %v1513_v49 = vadd.f32 %v1473_v42, %v3731_v51  ;;  %v1502_v50 = vpop.f32.mrf.mxu1  ;;  %v1948_v51 = vsel %vm1945_vm1, %v3053_v45, %v3054_v40 }
 0x49c   : > { %v3044_v16 = vunpack.i.h.bf16 %v3042_v47  ;;  %v3043_v4 = vunpack.i.l.bf16 %v3042_v47  ;;  %v1514_v53 = vadd.f32 %v1502_v50, %v3733_v52 }
 0x49d   : > { %v1950_v54 = vsel %vm1945_vm1, %v3024_v14, %v3038_v59  ;;  %v1951_v55 = vsel %vm1945_vm1, %v3038_v59, %v3039_v46  ;;  %v3766_v6 = vadd.f32 %v1556_v62, %v1513_v49 }
 0x49e   : > { %1987 = vmatpush.msrb.mxu0 %v1950_v54  ;;  %2016 = vmatpush.msrb.mxu1 %v1951_v55  ;;  %v2101_v60 = vsel %vm930_vm9, %v3034_v48, %v3043_v4  ;;  %v2102_v7 = vsel %vm930_vm9, %v3043_v4, %v3044_v16  ;;  %v3769_v26 = vadd.f32 %v1585_v29, %v1514_v53 }
 0x49f   : > { %2144 = vmatpush.msrb.mxu2 %v2101_v60  ;;  %2173 = vmatpush.msrb.mxu3 %v2102_v7 }
 0x4a0   : > { %1988 = vmatpush.msrb.mxu0 %v1948_v51  ;;  %2761 = vmatmul.msk.f32.vlgmr.msrb.gmra.mxu2 %vm571_vm2, %v2061_v31 }
 0x4a1   : > { %2765 = vmatmul.msk.f32.vlgmr.msrb.gmra.mxu3 %vm571_vm2, %v2061_v31 }
 0x4a2   : > { %v3057_v52 = vpop.permute.xlu1 %3056  ;;  %v1476_v9 = vpop.f32.mrf.mxu0 }
 0x4a3   : > { %v3059_v56 = vunpack.i.h.bf16 %v3057_v52  ;;  %v3058_v30 = vunpack.i.l.bf16 %v3057_v52  ;;  %v3062_v8 = vpop.permute.xlu0 %3061  ;;  %v1515_v13 = vadd.f32 %v1476_v9, %v3735_v1  ;;  %v1505_v15 = vpop.f32.mrf.mxu1  ;;  %v1914_v1 = vld [vmem:[#allocation3 + $0xe8] sm:$0xff] }
 0x4a4   : > { %v3064_v10 = vunpack.i.h.bf16 %v3062_v8  ;;  %v3063_v61 = vunpack.i.l.bf16 %v3062_v8  ;;  %v1516_v19 = vadd.f32 %v1505_v15, %v3737_v5  ;;  %v2063_v5 = vld [vmem:[#allocation3 + $0x110] sm:$0xff] }
 0x4a5   : > { %v1949_v17 = vsel %vm1945_vm1, %v3054_v40, %v3058_v30  ;;  %v1598_v24 = vadd.f32 %v1559_v44, %v1515_v13 }
 0x4a6   : > { %2017 = vmatpush.msrb.mxu1 %v1949_v17  ;;  %v1946_v20 = vsel %vm1945_vm1, %v3059_v56, %v3063_v61  ;;  %v1947_v21 = vsel %vm1945_vm1, %v3063_v61, %v3064_v10  ;;  %v1599_v27 = vadd.f32 %v1588_v25, %v1516_v19 }
 0x4a7   : > { %1989 = vmatpush.msrb.mxu0 %v1946_v20 }
 0x4a8   : > { %2753 = vmatmul.msk.f32.vlgmr.msrb.gmra.mxu0 %vm571_vm2, %v1913_v18  ;;  %2018 = vmatpush.msrb.mxu1 %v1947_v21 }
 0x4a9   : > { %2757 = vmatmul.msk.f32.vlgmr.msrb.gmra.mxu1 %vm571_vm2, %v1913_v18  ;;  %2762 = vmatmul.msk.f32.gmra.mxu2 %vm571_vm2, %v2062_v22  ;;  %v2217_v18 = vpop.permute.xlu2 %2216 }
 0x4aa   : > { %2766 = vmatmul.msk.f32.gmra.mxu3 %vm571_vm2, %v2062_v22  ;;  %v1479_v23 = vpop.f32.mrf.mxu0 }
 0x4ab   : > { %v1508_v33 = vpop.f32.mrf.mxu1  ;;  %v1517_v55 = vadd.f32 %v1479_v23, %v3741_v11 }
 0x4ac   : > { %v1518_v31 = vadd.f32 %v1508_v33, %v3743_v3 }
 0x4ad   : > { %v1600_v51 = vadd.f32 %v1562_v57, %v1517_v55 }
 0x4ae   : > { %v1601_v30 = vadd.f32 %v1591_v12, %v1518_v31 }
 0x4b0   : > { %2754 = vmatmul.msk.f32.gmra.mxu0 %vm571_vm2, %v1914_v1 }
 0x4b1   : > { %2758 = vmatmul.msk.f32.gmra.mxu1 %vm571_vm2, %v1914_v1  ;;  %2763 = vmatmul.msk.f32.gmra.mxu2 %vm571_vm2, %v2063_v5 }
 0x4b2   : > { %2767 = vmatmul.msk.f32.gmra.mxu3 %vm571_vm2, %v2063_v5 }
 0x4b8   : > { %2755 = vmatmul.msk.f32.gmra.mxu0 %vm571_vm2, %v1915_v28 }
 0x4b9   : > { %2759 = vmatmul.msk.f32.gmra.mxu1 %vm571_vm2, %v1915_v28  ;;  %2764 = vmatmul.msk.f32.gmra.mxu2 %vm571_vm2, %v2064_v58 }
 0x4ba   : > { %2768 = vmatmul.msk.f32.gmra.mxu3 %vm571_vm2, %v2064_v58 }
 0x4bb   : > { %v1863_v34 = vpop.f32.mrf.mxu2 }
 0x4bd   : > { %v1892_v35 = vpop.f32.mrf.mxu3  ;;  %v1708_v63 = vpop.f32.mrf.mxu0 }
 0x4be   : > { %v1737_v0 = vpop.f32.mrf.mxu1  ;;  %v1749_v15 = vadd.f32 %v1708_v63, %v3755_v37 }
 0x4bf   : > { %v1750_v11 = vadd.f32 %v1737_v0, %v3757_v39 }
 0x4c0   : > { %2756 = vmatmul.msk.f32.gmra.mxu0 %vm571_vm2, %v1916_v32 }
 0x4c1   : > { %2760 = vmatmul.msk.f32.gmra.mxu1 %vm571_vm2, %v1916_v32  ;;  %v1905_v58 = vadd.f32 %v1892_v35, %v1750_v11  ;;  %v2207_v35 = vpop.permute.xlu0 %2206 }
 0x4c5   : > { %v1866_v2 = vpop.f32.mrf.mxu2  ;;  %v1895_v41 = vpop.f32.mrf.mxu3 }
 0x4c6   : > { %v1711_v36 = vpop.f32.mrf.mxu0  ;;  %v1740_v38 = vpop.f32.mrf.mxu1 }
 0x4c7   : > { %v1751_v9 = vadd.f32 %v1711_v36, %v3766_v6  ;;  %v1752_v61 = vadd.f32 %v1740_v38, %v3769_v26  ;;  %v1904_v6 = vadd.f32 %v1863_v34, %v1749_v15 }
 0x4c9   : > { %v1906_v19 = vadd.f32 %v1866_v2, %v1751_v9  ;;  %v1907_v21 = vadd.f32 %v1895_v41, %v1752_v61  ;;  %v2212_v41 = vpop.permute.xlu1 %2211  ;;  %v2436_v9 = vld [vmem:[%s3966_s7 + $0x8] sm:$0xff]  ;;  %v2437_v61 = vld [vmem:[%s3966_s7 + $0x10] sm:$0xff] }
 0x4cd   : > { %v1869_v40 = vpop.f32.mrf.mxu2  ;;  %v1898_v43 = vpop.f32.mrf.mxu3 }
 0x4ce   : > { %v1714_v62 = vpop.f32.mrf.mxu0  ;;  %v1743_v45 = vpop.f32.mrf.mxu1 }
 0x4cf   : > { %v1753_v52 = vadd.f32 %v1714_v62, %v1598_v24  ;;  %v1754_v8 = vadd.f32 %v1743_v45, %v1599_v27 }
 0x4d1   : > { %v1908_v17 = vadd.f32 %v1869_v40, %v1753_v52  ;;  %v1909_v3 = vadd.f32 %v1898_v43, %v1754_v8  ;;  %v2470_v8 = vld [vmem:[%s3967_s8 + $0x18] sm:$0xff] }
 0x4d5   : > { %v1872_v14 = vpop.f32.mrf.mxu2  ;;  %v1901_v46 = vpop.f32.mrf.mxu3 }
 0x4d6   : > { %v1717_v59 = vpop.f32.mrf.mxu0  ;;  %v1746_v47 = vpop.f32.mrf.mxu1 }
 0x4d7   : > { %v1755_v10 = vadd.f32 %v1717_v59, %v1600_v51  ;;  %v1756_v13 = vadd.f32 %v1746_v47, %v1601_v30 }
 0x4d9   : > { %v1910_v44 = vadd.f32 %v1872_v14, %v1755_v10  ;;  %v1911_v22 = vadd.f32 %v1901_v46, %v1756_v13  ;;  %v2202_v14 = vpop.permute.xlu2 %2201  ;;  %v2469_v10 = vld [vmem:[%s3967_s8 + $0x10] sm:$0xff] }
 0x523   : > { %v2146_v42 = vpop.f32.mrf.mxu2 }
 0x524   : > { %v2175_v48 = vpop.f32.mrf.mxu3 }
 0x525   : > { %v1991_v16 = vpop.f32.mrf.mxu0 }
 0x526   : > { %v2020_v4 = vpop.f32.mrf.mxu1  ;;  %v2032_v57 = vadd.f32 %v1991_v16, %v1904_v6  ;;  %v3831_v16 = vld [vmem:[%s3970_s11 + $0x10] sm:$0xff] }
 0x527   : > { %v2033_v23 = vadd.f32 %v2020_v4, %v1905_v58  ;;  %v3840_v4 = vld [vmem:[%s3970_s11 + $0x18] sm:$0xff] }
 0x528   : > { %v2187_v34 = vadd.f32 %v2146_v42, %v2032_v57  ;;  %v3813_v42 = vld [vmem:[%s3970_s11] sm:$0xff] }
 0x529   : > { %v2188_v43 = vadd.f32 %v2175_v48, %v2033_v23  ;;  %v3822_v48 = vld [vmem:[%s3970_s11 + $0x8] sm:$0xff] }
 0x52a   : > { %v3804_v59 = vadd.f32 %v2202_v14, %v2187_v34  ;;  %v2468_v34 = vld [vmem:[%s3967_s8 + $0x8] sm:$0xff] }
 0x52b   : > { %v3806_v47 = vadd.f32 %v2202_v14, %v2188_v43 }
 0x52c   : > { %v2149_v49 = vpop.f32.mrf.mxu2 }
 0x52d   : > { %v1994_v50 = vpop.f32.mrf.mxu0  ;;  %v2178_v29 = vpop.f32.mrf.mxu3 }
 0x52e   : > { %v2023_v54 = vpop.f32.mrf.mxu1  ;;  %v2034_v1 = vadd.f32 %v1994_v50, %v1906_v19 }
 0x52f   : > { %v2035_v37 = vadd.f32 %v2023_v54, %v1907_v21 }
 0x530   : > { %v2189_v0 = vadd.f32 %v2149_v49, %v2034_v1 }
 0x531   : > { %v2190_v36 = vadd.f32 %v2178_v29, %v2035_v37 }
 0x532   : > { %v2221_v45 = vadd.f32 %v2207_v35, %v2189_v0 }
 0x533   : > { %v2222_v46 = vadd.f32 %v2207_v35, %v2190_v36  ;;  %v2467_v35 = vld [vmem:[%s3967_s8] sm:$0xff] }
 0x534   : > { %v2152_v53 = vpop.f32.mrf.mxu2 }
 0x535   : > { %v1997_v60 = vpop.f32.mrf.mxu0  ;;  %v2181_v7 = vpop.f32.mrf.mxu3 }
 0x536   : > { %v2026_v56 = vpop.f32.mrf.mxu1  ;;  %v2036_v20 = vadd.f32 %v1997_v60, %v1908_v17 }
 0x537   : > { %v2037_v24 = vadd.f32 %v2026_v56, %v1909_v3  ;;  %v2438_v56 = vld [vmem:[%s3966_s7 + $0x18] sm:$0xff] }
 0x538   : > { %v2191_v39 = vadd.f32 %v2152_v53, %v2036_v20 }
 0x539   : > { %v2192_v33 = vadd.f32 %v2181_v7, %v2037_v24 }
 0x53a   : > { %v2223_v40 = vadd.f32 %v2212_v41, %v2191_v39 }
 0x53b   : > { %v2224_v62 = vadd.f32 %v2212_v41, %v2192_v33 }
 0x53c   : > { %v2155_v27 = vpop.f32.mrf.mxu2 }
 0x53d   : > { %v2000_v25 = vpop.f32.mrf.mxu0  ;;  %v2184_v28 = vpop.f32.mrf.mxu3 }
 0x53e   : > { %v2038_v5 = vadd.f32 %v2000_v25, %v1910_v44  ;;  %v2029_v26 = vpop.f32.mrf.mxu1 }
 0x53f   : > { %v2039_v32 = vadd.f32 %v2029_v26, %v1911_v22 }
 0x540   : > { %v2193_v12 = vadd.f32 %v2155_v27, %v2038_v5 }
 0x541   : > { %v2194_v63 = vadd.f32 %v2184_v28, %v2039_v32 }
 0x542   : > { %v3798_v2 = vadd.f32 %v2217_v18, %v2193_v12 }
 0x543   : > { %v3800_v38 = vadd.f32 %v2217_v18, %v2194_v63 }
 0x544   : > { %2239 = vmatpush.msra.mxu0 %v3798_v2 }
 0x545   : > { %2268 = vmatpush.msra.mxu1 %v3800_v38 }
 0x546   : > { %2240 = vmatpush.msra.mxu0 %v2223_v40 }
 0x547   : > { %2269 = vmatpush.msra.mxu1 %v2224_v62 }
 0x548   : > { %2241 = vmatpush.msra.mxu0 %v2221_v45 }
 0x549   : > { %2270 = vmatpush.msra.mxu1 %v2222_v46 }
 0x54a   : > { %2242 = vmatpush.msra.mxu0 %v3804_v59 }
 0x54b   : > { %2271 = vmatpush.msra.mxu1 %v3806_v47  ;;  %2769 = vmatmul.msk.f32.vlgmr.msra.gmra.mxu0 %vm571_vm2, %v3813_v42 }
 0x54c   : > { %2773 = vmatmul.msk.f32.vlgmr.msra.gmra.mxu1 %vm571_vm2, %v3813_v42 }
 0x553   : > { %2770 = vmatmul.msk.f32.gmra.mxu0 %vm571_vm2, %v3822_v48 }
 0x554   : > { %2774 = vmatmul.msk.f32.gmra.mxu1 %vm571_vm2, %v3822_v48 }
 0x55b   : > { %2771 = vmatmul.msk.f32.gmra.mxu0 %vm571_vm2, %v3831_v16 }
 0x55c   : > { %2775 = vmatmul.msk.f32.gmra.mxu1 %vm571_vm2, %v3831_v16 }
 0x563   : > { %2772 = vmatmul.msk.f32.gmra.mxu0 %vm571_vm2, %v3840_v4 }
 0x564   : > { %2776 = vmatmul.msk.f32.gmra.mxu1 %vm571_vm2, %v3840_v4 }
 0x5c8   : > { %v2244_v49 = vpop.f32.mrf.mxu0 }
 0x5c9   : > { %v2273_v50 = vpop.f32.mrf.mxu1 }
 0x5ca   : > { %v2285_v30 = vadd.f32 %v2273_v50, %v2244_v49 }
 0x5d0   : > { %v2247_v29 = vpop.f32.mrf.mxu0 }
 0x5d1   : > { %v2276_v54 = vpop.f32.mrf.mxu1 }
 0x5d2   : > { %v2288_v55 = vadd.f32 %v2276_v54, %v2247_v29 }
 0x5d4   : > { %2289 = vadd.xlane.f32.xlu2 %v2288_v55 }
 0x5d8   : > { %v2250_v31 = vpop.f32.mrf.mxu0 }
 0x5d9   : > { %v2279_v53 = vpop.f32.mrf.mxu1 }
 0x5da   : > { %v2291_v60 = vadd.f32 %v2279_v53, %v2250_v31 }
 0x5dc   : > { %2292 = vadd.xlane.f32.xlu0 %v2291_v60 }
 0x5e0   : > { %v2253_v7 = vpop.f32.mrf.mxu0 }
 0x5e1   : > { %v2282_v51 = vpop.f32.mrf.mxu1 }
 0x5e2   : > { %v2294_v52 = vadd.f32 %v2282_v51, %v2253_v7 }
 0x5e4   : > { %2295 = vadd.xlane.f32.xlu1 %v2294_v52 }
 0x5ec   : > { %2456 = vperm.xlu2 %2824, %v2438_v56   ;;  %2286 = vadd.xlane.f32.xlu1 %v2285_v30 }
 0x5f0   : > { %2488 = vperm.xlu0 %2822, %v2470_v8  }
 0x5f4   : > { %2446 = vperm.xlu2 %2824, %v2436_v9  }
 0x5f8   : > { %2483 = vperm.xlu0 %2822, %v2469_v10  }
 0x605   : > { %2451 = vperm.xlu1 %2823, %v2437_v61  }
 0x647   : > { %v2290_v15 = vpop.xlane.xlu2 %2289 }
 0x648   : > { %v3871_v44 = vsub.f32 %v2221_v45, %v2290_v15  ;;  %v3873_v20 = vsub.f32 %v2222_v46, %v2290_v15 }
 0x64a   : > { %v2307_v27 = vmul.f32 %v3871_v44, %v3871_v44  ;;  %v2308_v6 = vmul.f32 %v3873_v20, %v3873_v20 }
 0x64f   : > { %v2293_v13 = vpop.xlane.xlu0 %2292 }
 0x650   : > { %v3861_v11 = vsub.f32 %v2223_v40, %v2293_v13  ;;  %v3863_v3 = vsub.f32 %v2224_v62, %v2293_v13  ;;  %v2524_v40 = vld [vmem:[%s3969_s10] sm:$0xf]  ;;  %v3927_v62 = vpop.permute.xlu2 %2456 }
 0x652   : > { %v2309_v24 = vmul.f32 %v3861_v11, %v3861_v11  ;;  %v2310_v25 = vmul.f32 %v3863_v3, %v3863_v3 }
 0x657   : > { %v2296_v17 = vpop.xlane.xlu1 %2295 }
 0x658   : > { %v3866_v18 = vsub.f32 %v3798_v2, %v2296_v17  ;;  %v3869_v19 = vsub.f32 %v3800_v38, %v2296_v17  ;;  %v2435_v38 = vld [vmem:[%s3966_s7] sm:$0xff] }
 0x65a   : > { %v2311_v21 = vmul.f32 %v3866_v18, %v3866_v18  ;;  %v2312_v22 = vmul.f32 %v3869_v19, %v3869_v19 }
 0x65c   : > { %2325 = vmatpush.msra.mxu2 %v2311_v21  ;;  %2354 = vmatpush.msra.mxu3 %v2312_v22 }
 0x65e   : > { %2326 = vmatpush.msra.mxu2 %v2309_v24  ;;  %2355 = vmatpush.msra.mxu3 %v2310_v25 }
 0x65f   : > { %v2287_v1 = vpop.xlane.xlu1 %2286 }
 0x660   : > { %v3888_v5 = vsub.f32 %v3804_v59, %v2287_v1  ;;  %v3891_v26 = vsub.f32 %v3806_v47, %v2287_v1  ;;  %2327 = vmatpush.msra.mxu2 %v2307_v27  ;;  %2356 = vmatpush.msra.mxu3 %v2308_v6  ;;  %v2447_v59 = vpop.permute.xlu2 %2446 }
 0x662   : > { %v2305_v28 = vmul.f32 %v3888_v5, %v3888_v5  ;;  %v2306_v58 = vmul.f32 %v3891_v26, %v3891_v26  ;;  %v3925_v43 = vpop.permute.xlu0 %2488 }
 0x664   : > { %2328 = vmatpush.msra.mxu2 %v2305_v28  ;;  %2357 = vmatpush.msra.mxu3 %v2306_v58 }
 0x665   : > { %2777 = vmatmul.msk.f32.vlgmr.msra.gmra.mxu2 %vm571_vm2, %v3813_v42  ;;  %2781 = vmatmul.msk.f32.vlgmr.msra.gmra.mxu3 %vm571_vm2, %v3813_v42 }
 0x66a   : > { %v3929_v45 = vpop.permute.xlu0 %2483 }
 0x66d   : > { %2778 = vmatmul.msk.f32.gmra.mxu2 %vm571_vm2, %v3822_v48  ;;  %2782 = vmatmul.msk.f32.gmra.mxu3 %vm571_vm2, %v3822_v48 }
 0x675   : > { %2779 = vmatmul.msk.f32.gmra.mxu2 %vm571_vm2, %v3831_v16  ;;  %2783 = vmatmul.msk.f32.gmra.mxu3 %vm571_vm2, %v3831_v16 }
 0x677   : > { %v2452_v14 = vpop.permute.xlu1 %2451 }
 0x67d   : > { %2780 = vmatmul.msk.f32.gmra.mxu2 %vm571_vm2, %v3840_v4  ;;  %2784 = vmatmul.msk.f32.gmra.mxu3 %vm571_vm2, %v3840_v4 }
 0x6e8   : > { %v2330_v37 = vpop.f32.mrf.mxu2  ;;  %v2359_v32 = vpop.f32.mrf.mxu3 }
 0x6e9   : > { %v2371_v57 = vadd.f32 %v2359_v32, %v2330_v37 }
 0x6eb   : > { %2372 = vadd.xlane.f32.xlu0 %v2371_v57 }
 0x6f0   : > { %v2333_v39 = vpop.f32.mrf.mxu2  ;;  %v2362_v12 = vpop.f32.mrf.mxu3 }
 0x6f1   : > { %v2374_v23 = vadd.f32 %v2362_v12, %v2333_v39 }
 0x6f3   : > { %2375 = vadd.xlane.f32.xlu1 %v2374_v23 }
 0x6f8   : > { %v2336_v33 = vpop.f32.mrf.mxu2  ;;  %v2365_v63 = vpop.f32.mrf.mxu3 }
 0x6f9   : > { %v2377_v0 = vadd.f32 %v2365_v63, %v2336_v33 }
 0x6fb   : > { %2378 = vadd.xlane.f32.xlu2 %v2377_v0 }
 0x700   : > { %v2339_v2 = vpop.f32.mrf.mxu2  ;;  %v2368_v41 = vpop.f32.mrf.mxu3 }
 0x701   : > { %v2380_v36 = vadd.f32 %v2368_v41, %v2339_v2 }
 0x703   : > { %2381 = vadd.xlane.f32.xlu0 %v2380_v36 }
 0x70c   : > { %2441 = vperm.xlu1 %2823, %v2435_v38  }
 0x713   : > { %2478 = vperm.xlu2 %2824, %v2468_v34  }
 0x714   : > { %2527 = vperm.xlu1 %2823, %v2524_v40  }
 0x717   : > { %2473 = vperm.xlu0 %2822, %v2467_v35  }
 0x75e   : > { %v2373_v46 = vpop.xlane.xlu0 %2372 }
 0x75f   : > { %v2383_v48 = vadd.f32 1e-05, %v2373_v46 }
 0x761   : > { %vm2393_vm11 = vweird.f32 %v2383_v48 }
 0x766   : > { %v2376_v47 = vpop.xlane.xlu1 %2375 }
 0x767   : > { %v2384_v42 = vadd.f32 1e-05, %v2376_v47 }
 0x769   : > { %3073 = vrsqrt.f32 %v2384_v42  ;;  %vm2403_vm7 = vweird.f32 %v2384_v42 }
 0x76a   : > { %3075 = vrsqrt.f32 %v2383_v48 }
 0x76e   : > { %v2379_v16 = vpop.xlane.xlu2 %2378 }
 0x76f   : > { %v3074_v4 = vpop.eup %3073  ;;  %v2385_v49 = vadd.f32 1e-05, %v2379_v16 }
 0x770   : > { %v2398_v50 = vmul.f32 %v3074_v4, %v2384_v42  ;;  %v3076_v29 = vpop.eup %3075  ;;  %vm2404_vm4 = vweird.f32 %v3074_v4 }
 0x771   : > { %3077 = vrsqrt.f32 %v2385_v49  ;;  %v2388_v55 = vmul.f32 %v3076_v29, %v2383_v48  ;;  %vm2413_vm5 = vweird.f32 %v2385_v49  ;;  %vm2405_vm8 = vmor %vm2403_vm7, %vm2404_vm4  ;;  %vm2394_vm9 = vweird.f32 %v3076_v29 }
 0x772   : > { %v2399_v54 = vmul.f32 %v3074_v4, %v2398_v50  ;;  %vm2395_vm12 = vmor %vm2393_vm11, %vm2394_vm9 }
 0x773   : > { %v2389_v52 = vmul.f32 %v3076_v29, %v2388_v55 }
 0x774   : > { %v2400_v7 = vmul.f32 0.5, %v2399_v54 }
 0x775   : > { %v2390_v9 = vmul.f32 0.5, %v2389_v52 }
 0x776   : > { %v2382_v31 = vpop.xlane.xlu0 %2381  ;;  %v2401_v30 = vsub.f32 1.5, %v2400_v7  ;;  %v2479_v35 = vpop.permute.xlu2 %2478 }
 0x777   : > { %v3078_v53 = vpop.eup %3077  ;;  %v2386_v60 = vadd.f32 1e-05, %v2382_v31  ;;  %v2391_v21 = vsub.f32 1.5, %v2390_v9  ;;  %v2575_v9 = vld.sshfl [vmem:[#allocation1 + $0x8] sm:$0xff pattern:$0x75316420] }
 0x778   : > { %v2408_v51 = vmul.f32 %v3078_v53, %v2385_v49  ;;  %vm2414_vm3 = vweird.f32 %v3078_v53  ;;  %v2402_v15 = vmul.f32 %v3074_v4, %v2401_v30  ;;  %v2574_v30 = vld.sshfl [vmem:[#allocation1] sm:$0xff pattern:$0x75316420] }
 0x779   : > { %3079 = vrsqrt.f32 %v2386_v60  ;;  %vm2415_vm6 = vmor %vm2413_vm5, %vm2414_vm3  ;;  %v2392_v28 = vmul.f32 %v3076_v29, %v2391_v21  ;;  %vm2423_vm13 = vweird.f32 %v2386_v60 }
 0x77a   : > { %v2409_v56 = vmul.f32 %v3078_v53, %v2408_v51  ;;  %v2406_v6 = vsel %vm2405_vm8, %v3074_v4, %v2402_v15 }
 0x77b   : > { %v2429_v37 = vmul.f32 %v2406_v6, %v3871_v44  ;;  %v2430_v32 = vmul.f32 %v2406_v6, %v3873_v20 }
 0x77c   : > { %v2410_v8 = vmul.f32 0.5, %v2409_v56 }
 0x77d   : > { %v2462_v33 = vmul.f32 %v2447_v59, %v2430_v32 }
 0x77e   : > { %v2411_v10 = vsub.f32 1.5, %v2410_v8  ;;  %v2442_v2 = vpop.permute.xlu1 %2441 }
 0x77f   : > { %v3080_v61 = vpop.eup %3079 }
 0x780   : > { %v2412_v13 = vmul.f32 %v3078_v53, %v2411_v10  ;;  %v2418_v17 = vmul.f32 %v3080_v61, %v2386_v60  ;;  %vm2424_vm10 = vweird.f32 %v3080_v61  ;;  %v2523_v60 = vld [vmem:[%s3968_s9] sm:$0xf] }
 0x781   : > { %vm2425_vm14 = vmor %vm2423_vm13, %vm2424_vm10 }
 0x782   : > { %v2416_v22 = vsel %vm2415_vm6, %v3078_v53, %v2412_v13  ;;  %v2419_v24 = vmul.f32 %v3080_v61, %v2418_v17 }
 0x783   : > { %v2431_v25 = vmul.f32 %v2416_v22, %v3861_v11  ;;  %v2432_v27 = vmul.f32 %v2416_v22, %v3863_v3  ;;  %v2396_v11 = vsel %vm2395_vm12, %v3076_v29, %v2392_v28  ;;  %v2461_v3 = vmul.f32 %v2447_v59, %v2429_v37 }
 0x784   : > { %v2420_v1 = vmul.f32 0.5, %v2419_v24  ;;  %v2427_v41 = vmul.f32 %v2396_v11, %v3888_v5  ;;  %v2428_v44 = vmul.f32 %v2396_v11, %v3891_v26  ;;  %v2494_v59 = vadd.f32 %v2479_v35, %v2462_v33 }
 0x785   : > { %v2463_v39 = vmul.f32 %v2452_v14, %v2431_v25  ;;  %v2464_v12 = vmul.f32 %v2452_v14, %v2432_v27 }
 0x786   : > { %v2421_v58 = vsub.f32 1.5, %v2420_v1  ;;  %v2459_v14 = vmul.f32 %v2442_v2, %v2427_v41  ;;  %v2460_v46 = vmul.f32 %v2442_v2, %v2428_v44  ;;  %v2510_v4 = vmul.f32 0.1, %v2494_v59  ;;  %v2528_v52 = vpop.permute.xlu1 %2527 }
 0x787   : > { %v2495_v20 = vadd.f32 %v3929_v45, %v2463_v39  ;;  %v2496_v36 = vadd.f32 %v3929_v45, %v2464_v12  ;;  %vm2502_vm6 = vcmp.ge.f32.partialorder %v2494_v59, 0.0 }
 0x788   : > { %v2422_v57 = vmul.f32 %v3080_v61, %v2421_v58  ;;  %v2518_v53 = vsel %vm2502_vm6, %v2494_v59, %v2510_v4 }
 0x789   : > { %v2474_v38 = vpop.permute.xlu0 %2473  ;;  %v2511_v42 = vmul.f32 0.1, %v2495_v20  ;;  %v2512_v48 = vmul.f32 0.1, %v2496_v36  ;;  %vm2503_vm3 = vcmp.ge.f32.partialorder %v2495_v20, 0.0  ;;  %vm2504_vm4 = vcmp.ge.f32.partialorder %v2496_v36, 0.0 }
 0x78a   : > { %v2426_v23 = vsel %vm2425_vm14, %v3080_v61, %v2422_v57  ;;  %v2491_v47 = vadd.f32 %v2474_v38, %v2459_v14  ;;  %v2492_v26 = vadd.f32 %v2474_v38, %v2460_v46 }
 0x78b   : > { %v2433_v63 = vmul.f32 %v2426_v23, %v3866_v18  ;;  %v2434_v0 = vmul.f32 %v2426_v23, %v3869_v19  ;;  %v2493_v18 = vadd.f32 %v2479_v35, %v2461_v3  ;;  %v2519_v54 = vsel %vm2503_vm3, %v2495_v20, %v2511_v42 }
 0x78c   : > { %v2507_v29 = vmul.f32 0.1, %v2491_v47  ;;  %v2520_v55 = vsel %vm2504_vm4, %v2496_v36, %v2512_v48  ;;  %vm2499_vm7 = vcmp.ge.f32.partialorder %v2491_v47, 0.0  ;;  %vm2500_vm8 = vcmp.ge.f32.partialorder %v2492_v26, 0.0 }
 0x78d   : > { %v2465_v34 = vmul.f32 %v3927_v62, %v2433_v63  ;;  %v2466_v40 = vmul.f32 %v3927_v62, %v2434_v0  ;;  %v2509_v62 = vmul.f32 0.1, %v2493_v18  ;;  %vm2501_vm5 = vcmp.ge.f32.partialorder %v2493_v18, 0.0 }
 0x78e   : > { %v2515_v7 = vsel %vm2499_vm7, %v2491_v47, %v2507_v29 }
 0x78f   : > { %v2497_v19 = vadd.f32 %v3925_v43, %v2465_v34  ;;  %v2498_v5 = vadd.f32 %v3925_v43, %v2466_v40  ;;  %v2508_v43 = vmul.f32 0.1, %v2492_v26  ;;  %v2517_v31 = vsel %vm2501_vm5, %v2493_v18, %v2509_v62 }
 0x791   : > { %vm2505_vm15 = vcmp.ge.f32.partialorder %v2497_v19, 0.0  ;;  %v2513_v45 = vmul.f32 0.1, %v2497_v19  ;;  %vm2506_vm1 = vcmp.ge.f32.partialorder %v2498_v5, 0.0  ;;  %v2514_v16 = vmul.f32 0.1, %v2498_v5 }
 0x792   : > { %v2516_v51 = vsel %vm2500_vm8, %v2492_v26, %v2508_v43 }
 0x793   : > { %v2521_v49 = vsel %vm2505_vm15, %v2497_v19, %v2513_v45  ;;  %v2522_v50 = vsel %vm2506_vm1, %v2498_v5, %v2514_v16 }
 0x794   : > { %2545 = vmatpush.msrb.mxu0 %v2521_v49  ;;  %2565 = vmatpush.msrb.mxu1 %v2522_v50 }
 0x796   : > { %2546 = vmatpush.msrb.mxu0 %v2519_v54  ;;  %2566 = vmatpush.msrb.mxu1 %v2520_v55 }
 0x798   : > { %2547 = vmatpush.msrb.mxu0 %v2517_v31  ;;  %2567 = vmatpush.msrb.mxu1 %v2518_v53 }
 0x79a   : > { %2548 = vmatpush.msrb.mxu0 %v2515_v7  ;;  %2568 = vmatpush.msrb.mxu1 %v2516_v51 }
 0x79b   : > { %2785 = vmatmul.msk.f32.vlgmr.msrb.gmra.mxu0 %vm571_vm2, %v2523_v60  ;;  %2786 = vmatmul.msk.f32.vlgmr.msrb.gmra.mxu1 %vm571_vm2, %v2523_v60 }
 0x818   : > { %v2550_v56 = vpop.f32.mrf.mxu0  ;;  %v2570_v8 = vpop.f32.mrf.mxu1 }
 0x819   : > { %v2551_v10 = vadd.f32 %v2550_v56, %v2528_v52  ;;  %v2571_v61 = vadd.f32 %v2570_v8, %v2528_v52 }
 0x81b   : > { %v2578_v13 = vadd.f32 %v2574_v30, %v2551_v10  ;;  %v2579_v15 = vadd.f32 %v2575_v9, %v2571_v61 }
 0x81d   : > { %v2582_v17 = vmul.f32 0.1, %v2578_v13  ;;  %vm2581_vm9 = vcmp.ge.f32.partialorder %v2579_v15, 0.0  ;;  %v2583_v21 = vmul.f32 0.1, %v2579_v15  ;;  %vm2580_vm10 = vcmp.ge.f32.partialorder %v2578_v13, 0.0 }
 0x81f   : > { %v2585_v22 = vsel %vm2581_vm9, %v2579_v15, %v2583_v21  ;;  %v2584_v25 = vsel %vm2580_vm10, %v2578_v13, %v2582_v17 }
 0x820   : > { %v2588_v24 = vrot.slane %v2585_v22, 4 }
 0x822   : > { %v2589_v27 = vsel %vm508_vm0, %v2584_v25, %v2588_v24 }
 0x823   : > { %2591 = vst [vmem:[%s457_s28] sm:$0xff] %v2589_v27 }
 0x824 PF: > { %s24_s25 = sadd.s32 1, %s3125_s25  }
 0x825   : > { %p21_p7 = scmp.ge.s32.totalorder %s24_s25, 4  }
 0x827   :  { %23 = sbr.rel (!%p21_p7) target bundleno = 1 (0x1), region = 116 }
 0x82c   :  { %2613 = vsyncpa [#allocation4], 1 }
 0x82d   :  { %2615 = vsyncpa [#allocation4 + $0x1], 1 }

</bundles_post_ra>
